<compile_context>
chip_gen: v5e
topology: v5e:2x2
jax: 0.10.0
libtpu: 0.0.40
codegen_flags: <defaults>
</compile_context>

<pallas_src>
import functools

import jax
import jax.numpy as jnp
from jax.experimental import pallas as pl
from jax.experimental.pallas import tpu as pltpu


def _round_up(x, m):
    return (x + m - 1) // m * m


# ----------------------------------------------------------------------------
# Pallas kernel: fused branch layer (block-diagonal) + 2 dense layers + row head.
# ----------------------------------------------------------------------------
def _mlp_predictor_kernel(x_ref,    # (Bp, Din_p)  f32  concat([dst_p, omni_0..N-1]), zero-padded
                          wb_ref,   # (Din_p, H1_p) bf16 block-diag branch weights (pre-transposed)
                          bb_ref,   # (1, H1_p)    f32  concat of branch biases
                          w1_ref,   # (H1_p, H1_p) bf16 linear_1 weight (pre-transposed, padded)
                          b1_ref,   # (1, H1_p)    f32
                          w2_ref,   # (H1_p, H2_p) bf16 linear_2
                          b2_ref,   # (1, H2_p)    f32
                          w3_ref,   # (1, H2_p)    f32  linear_3 as a single row
                          b3_ref,   # (1, OUTL)    f32  b3 scalar broadcast along lanes
                          out_ref): # (Bp, OUTL)   f32  lane-dense; real value in lane 0
    f32 = jnp.float32
    # dst_p_net + omni_nets + concat, as one block-diagonal matmul (one MXU push).
    h = jnp.dot(x_ref[...], wb_ref[...].astype(f32), preferred_element_type=f32) + bb_ref[...]
    h = jnp.maximum(h, 0.0)
    # linear_1 (FCLayer: Linear + ReLU)
    h = jnp.dot(h, w1_ref[...].astype(f32), preferred_element_type=f32) + b1_ref[...]
    h = jnp.maximum(h, 0.0)
    # linear_2 (FCLayer: Linear + ReLU)
    h = jnp.dot(h, w2_ref[...].astype(f32), preferred_element_type=f32) + b2_ref[...]
    h = jnp.maximum(h, 0.0)
    # linear_3: 1-wide Linear head as VPU multiply + XLU lane reduction (no MXU, no
    # 128x128 zero-padded w3 DMA).  See TODO at top about a possible final ReLU.
    y = jnp.sum(h * w3_ref[...], axis=-1, keepdims=True)          # (Bp, 1)
    out_ref[...] = y + b3_ref[...]                                 # broadcast -> lane-dense store


# ----------------------------------------------------------------------------
# One-time weight packing (NOT in the per-call path).
# ----------------------------------------------------------------------------
def pack_params(params, len_dst_p, len_omni, num_omni_pqs):
    """Build padded / transposed / block-diagonal device-resident weights once."""
    f32, bf16 = jnp.float32, jnp.bfloat16
    n = num_omni_pqs
    h1 = params["w_dst"].shape[0]              # h_dim_1 = 100
    h1_cat = h1 * (1 + n)                      # 100 * (1 + N)
    h2_cat = params["w2"].shape[0]             # 10  * (1 + N)
    d_in = len_dst_p + n * len_omni

    d_in_p = _round_up(d_in, 16)               # bf16 sublane packing for wb; no 128-lane blowup
    h1_p = _round_up(h1_cat, 128)              # 512: also a multiple of 256 (v6e/v7x MXU cols)
    h2_p = _round_up(h2_cat, 128)
    out_p = 128                                # lane-dense output slab; lane 0 is the real output

    # branch layers as one block-diagonal (in, out) weight
    wb = jnp.zeros((d_in_p, h1_p), f32)
    bb = jnp.zeros((1, h1_p), f32)
    wb = wb.at[:len_dst_p, :h1].set(params["w_dst"].T.astype(f32))
    bb = bb.at[0, :h1].set(params["b_dst"].astype(f32))
    row = len_dst_p
    for i in range(n):
        wb = wb.at[row:row + len_omni,
                   (i + 1) * h1:(i + 2) * h1].set(params["w_omni"][i].T.astype(f32))
        bb = bb.at[0, (i + 1) * h1:(i + 2) * h1].set(params["b_omni"][i].astype(f32))
        row += len_omni

    # dense layers, zero-padded & pre-transposed
    w1 = jnp.zeros((h1_p, h1_p), f32).at[:h1_cat, :h1_cat].set(params["w1"].T.astype(f32))
    b1 = jnp.zeros((1, h1_p), f32).at[0, :h1_cat].set(params["b1"].astype(f32))
    w2 = jnp.zeros((h1_p, h2_p), f32).at[:h1_cat, :h2_cat].set(params["w2"].T.astype(f32))
    b2 = jnp.zeros((1, h2_p), f32).at[0, :h2_cat].set(params["b2"].astype(f32))
    w3_row = jnp.zeros((1, h2_p), f32).at[0, :h2_cat].set(params["w3"][0].astype(f32))
    b3_row = jnp.full((1, out_p), params["b3"][0], f32)

    packed = {
        # big weight matrices stored bf16 in HBM (halves weight DMA); biases stay f32
        "wb": wb.astype(bf16), "bb": bb,
        "w1": w1.astype(bf16), "b1": b1,
        "w2": w2.astype(bf16), "b2": b2,
        "w3_row": w3_row, "b3_row": b3_row,
    }
    return jax.tree_util.tree_map(jax.device_put, packed)


# ----------------------------------------------------------------------------
# Per-call forward: concat + pad inputs, call the kernel, slice the output.
# ----------------------------------------------------------------------------
def mlp_predictor_forward(dst_p, omni_list, packed):
    """dst_p: (B, len_dst_p); omni_list: tuple of N arrays (B, len_omni). Returns (B, 1)."""
    f32 = jnp.float32
    B = dst_p.shape[0]
    x_cat = jnp.concatenate(
        [dst_p.astype(f32)] + [o.astype(f32) for o in omni_list], axis=1)
    d_in = x_cat.shape[1]

    Bp = _round_up(B, 8)
    d_in_p = packed["wb"].shape[0]
    out_p = packed["b3_row"].shape[1]
    x_pad = jnp.pad(x_cat, ((0, Bp - B), (0, d_in_p - d_in)))

    vmem = pl.BlockSpec(memory_space=pltpu.MemorySpace.VMEM)
    out_padded = pl.pallas_call(
        _mlp_predictor_kernel,
        out_shape=jax.ShapeDtypeStruct((Bp, out_p), f32),
        in_specs=[vmem] * 9,
        out_specs=vmem,
    )(x_pad, packed["wb"], packed["bb"], packed["w1"], packed["b1"],
      packed["w2"], packed["b2"], packed["w3_row"], packed["b3_row"])

    return out_padded[:B, :1]


# ----------------------------------------------------------------------------
# Pure-JAX reference (mirrors the PyTorch forward, unpadded / unfused).
# ----------------------------------------------------------------------------
def reference_forward(dst_p, omni_list, params):
    h = jnp.maximum(dst_p @ params["w_dst"].T + params["b_dst"], 0.0)
    for i, o in enumerate(omni_list):
        h2 = jnp.maximum(o @ params["w_omni"][i].T + params["b_omni"][i], 0.0)
        h = jnp.concatenate([h, h2], axis=1)
    h3 = jnp.maximum(h @ params["w1"].T + params["b1"], 0.0)
    h4 = jnp.maximum(h3 @ params["w2"].T + params["b2"], 0.0)
    return h4 @ params["w3"].T + params["b3"]


# ----------------------------------------------------------------------------
# Deterministic parameter construction (PyTorch Linear default init).
# ----------------------------------------------------------------------------
def init_params(key, len_dst_p, len_omni, num_omni_pqs, h_dim_1=100, h_dim_2=10):
    nv = 1 + num_omni_pqs
    keys = jax.random.split(key, 8 + 2 * num_omni_pqs)
    kit = iter(keys)

    def lin(out_f, in_f):
        bound = 1.0 / float(in_f) ** 0.5
        w = jax.random.uniform(next(kit), (out_f, in_f), jnp.float32, -bound, bound)
        b = jax.random.uniform(next(kit), (out_f,), jnp.float32, -bound, bound)
        return w, b

    w_dst, b_dst = lin(h_dim_1, len_dst_p)
    w_omni, b_omni = [], []
    for _ in range(num_omni_pqs):
        w, b = lin(h_dim_1, len_omni)
        w_omni.append(w)
        b_omni.append(b)
    w1, b1 = lin(h_dim_1 * nv, h_dim_1 * nv)
    w2, b2 = lin(h_dim_2 * nv, h_dim_1 * nv)
    w3, b3 = lin(1, h_dim_2 * nv)

    return {
        "w_dst": w_dst, "b_dst": b_dst,
        "w_omni": w_omni, "b_omni": b_omni,
        "w1": w1, "b1": b1,
        "w2": w2, "b2": b2,
        "w3": w3, "b3": b3,
    }


if __name__ == "__main__":
    key = jax.random.PRNGKey(0)
    k_param, k_dst, k_omni = jax.random.split(key, 3)

    B = 2
    len_dst_p = 16
    len_omni = 16
    num_omni_pqs = 3          # -> concat hidden = 400, linear_2 out = 40

    params = init_params(k_param, len_dst_p, len_omni, num_omni_pqs)
    packed = pack_params(params, len_dst_p, len_omni, num_omni_pqs)   # one-time, off hot path

    dst_p = jax.random.normal(k_dst, (B, len_dst_p), jnp.float32)
    omni_keys = jax.random.split(k_omni, num_omni_pqs)
    omni_list = tuple(jax.random.normal(k, (B, len_omni), jnp.float32)
                      for k in omni_keys)

    forward = jax.jit(mlp_predictor_forward)
    out = jax.block_until_ready(forward(dst_p, omni_list, packed))

    # Reference 1: full-f32 weights (loose tolerance; kernel stores weights in bf16).
    ref_f32 = jax.block_until_ready(reference_forward(dst_p, omni_list, params))

    # Reference 2: same bf16-rounded weights as the kernel (tight-ish tolerance).
    def _q(w):
        return w.astype(jnp.bfloat16).astype(jnp.float32)
    params_q = dict(params)
    params_q["w_dst"] = _q(params["w_dst"])
    params_q["w_omni"] = [_q(w) for w in params["w_omni"]]
    params_q["w1"] = _q(params["w1"])
    params_q["w2"] = _q(params["w2"])
    ref_q = jax.block_until_ready(reference_forward(dst_p, omni_list, params_q))

    assert out.shape == (B, 1), out.shape
    assert jnp.allclose(out, ref_q, atol=2e-2, rtol=2e-2), (out, ref_q)
    assert jnp.allclose(out, ref_f32, atol=2e-1, rtol=2e-1), (out, ref_f32)  # gross-bug guard
    print("KERNEL_OK")
</pallas_src>

<mosaic_0001>
module attributes {stable_mosaic.version = 11 : i64} {
  func.func @_mlp_predictor_kernel(%arg0: memref<8x64xf32, #tpu.memory_space<vmem>>, %arg1: memref<64x512xbf16, #tpu.memory_space<vmem>>, %arg2: memref<1x512xf32, #tpu.memory_space<vmem>>, %arg3: memref<512x512xbf16, #tpu.memory_space<vmem>>, %arg4: memref<1x512xf32, #tpu.memory_space<vmem>>, %arg5: memref<512x128xbf16, #tpu.memory_space<vmem>>, %arg6: memref<1x128xf32, #tpu.memory_space<vmem>>, %arg7: memref<1x128xf32, #tpu.memory_space<vmem>>, %arg8: memref<1x128xf32, #tpu.memory_space<vmem>>, %arg9: memref<8x128xf32, #tpu.memory_space<vmem>>) attributes {dimension_semantics = [], scalar_prefetch = 0 : i64, scratch_operands = 0 : i64, tpu.core_type = #tpu.core_type<tc>} {
    %c0 = arith.constant 0 : index
    %c0_0 = arith.constant 0 : index
    %0 = vector.load %arg0[%c0, %c0_0] : memref<8x64xf32, #tpu.memory_space<vmem>>, vector<8x64xf32>
    %c0_1 = arith.constant 0 : index
    %c0_2 = arith.constant 0 : index
    %1 = vector.load %arg1[%c0_1, %c0_2] : memref<64x512xbf16, #tpu.memory_space<vmem>>, vector<64x512xbf16>
    %2 = arith.extf %1 : vector<64x512xbf16> to vector<64x512xf32>
    %cst = arith.constant dense<0.000000e+00> : vector<8x512xf32>
    %3 = tpu.matmul %0, %2, %cst {dimension_numbers = #tpu.dot_dimension_numbers<[1], [0], [0], [1], [0, 0, 1, 1], [], []>} : vector<8x64xf32>, vector<64x512xf32>, vector<8x512xf32> -> vector<8x512xf32>
    %c0_3 = arith.constant 0 : index
    %c0_4 = arith.constant 0 : index
    %4 = vector.load %arg2[%c0_3, %c0_4] : memref<1x512xf32, #tpu.memory_space<vmem>>, vector<1x512xf32>
    %5 = vector.broadcast %4 : vector<1x512xf32> to vector<8x512xf32>
    %6 = arith.addf %3, %5 : vector<8x512xf32>
    %cst_5 = arith.constant 0.000000e+00 : f32
    %7 = vector.broadcast %cst_5 : f32 to vector<8x512xf32>
    %8 = arith.maximumf %6, %7 : vector<8x512xf32>
    %c0_6 = arith.constant 0 : index
    %c0_7 = arith.constant 0 : index
    %9 = vector.load %arg3[%c0_6, %c0_7] : memref<512x512xbf16, #tpu.memory_space<vmem>>, vector<512x512xbf16>
    %10 = arith.extf %9 : vector<512x512xbf16> to vector<512x512xf32>
    %cst_8 = arith.constant dense<0.000000e+00> : vector<8x512xf32>
    %11 = tpu.matmul %8, %10, %cst_8 {dimension_numbers = #tpu.dot_dimension_numbers<[1], [0], [0], [1], [0, 0, 1, 1], [], []>} : vector<8x512xf32>, vector<512x512xf32>, vector<8x512xf32> -> vector<8x512xf32>
    %c0_9 = arith.constant 0 : index
    %c0_10 = arith.constant 0 : index
    %12 = vector.load %arg4[%c0_9, %c0_10] : memref<1x512xf32, #tpu.memory_space<vmem>>, vector<1x512xf32>
    %13 = vector.broadcast %12 : vector<1x512xf32> to vector<8x512xf32>
    %14 = arith.addf %11, %13 : vector<8x512xf32>
    %cst_11 = arith.constant 0.000000e+00 : f32
    %15 = vector.broadcast %cst_11 : f32 to vector<8x512xf32>
    %16 = arith.maximumf %14, %15 : vector<8x512xf32>
    %c0_12 = arith.constant 0 : index
    %c0_13 = arith.constant 0 : index
    %17 = vector.load %arg5[%c0_12, %c0_13] : memref<512x128xbf16, #tpu.memory_space<vmem>>, vector<512x128xbf16>
    %18 = arith.extf %17 : vector<512x128xbf16> to vector<512x128xf32>
    %cst_14 = arith.constant dense<0.000000e+00> : vector<8x128xf32>
    %19 = tpu.matmul %16, %18, %cst_14 {dimension_numbers = #tpu.dot_dimension_numbers<[1], [0], [0], [1], [0, 0, 1, 1], [], []>} : vector<8x512xf32>, vector<512x128xf32>, vector<8x128xf32> -> vector<8x128xf32>
    %c0_15 = arith.constant 0 : index
    %c0_16 = arith.constant 0 : index
    %20 = vector.load %arg6[%c0_15, %c0_16] : memref<1x128xf32, #tpu.memory_space<vmem>>, vector<1x128xf32>
    %21 = vector.broadcast %20 : vector<1x128xf32> to vector<8x128xf32>
    %22 = arith.addf %19, %21 : vector<8x128xf32>
    %cst_17 = arith.constant 0.000000e+00 : f32
    %23 = vector.broadcast %cst_17 : f32 to vector<8x128xf32>
    %24 = arith.maximumf %22, %23 : vector<8x128xf32>
    %c0_18 = arith.constant 0 : index
    %c0_19 = arith.constant 0 : index
    %25 = vector.load %arg7[%c0_18, %c0_19] : memref<1x128xf32, #tpu.memory_space<vmem>>, vector<1x128xf32>
    %26 = vector.broadcast %25 : vector<1x128xf32> to vector<8x128xf32>
    %27 = arith.mulf %24, %26 : vector<8x128xf32>
    %cst_20 = arith.constant dense<0.000000e+00> : vector<8xf32>
    %28 = vector.multi_reduction <add>, %27, %cst_20 [1] : vector<8x128xf32> to vector<8xf32>
    %29 = vector.shape_cast %28 : vector<8xf32> to vector<8x1xf32>
    %c0_21 = arith.constant 0 : index
    %c0_22 = arith.constant 0 : index
    %30 = vector.load %arg8[%c0_21, %c0_22] : memref<1x128xf32, #tpu.memory_space<vmem>>, vector<1x128xf32>
    %31 = vector.broadcast %29 : vector<8x1xf32> to vector<8x128xf32>
    %32 = vector.broadcast %30 : vector<1x128xf32> to vector<8x128xf32>
    %33 = arith.addf %31, %32 : vector<8x128xf32>
    %c0_23 = arith.constant 0 : index
    %c0_24 = arith.constant 0 : index
    %34 = vector.load %arg9[%c0_23, %c0_24] : memref<8x128xf32, #tpu.memory_space<vmem>>, vector<8x128xf32>
    tpu.vector_store %arg9[%c0_23, %c0_24], %33 {strides = array<i32>} : memref<8x128xf32, #tpu.memory_space<vmem>>, vector<8x128xf32>,
    return
  }
}

</mosaic_0001>

<bundles_post_ra>
// kernel: mlp_predictor_forward.1
= control target key start
LH: loop header
LB: loop body
LE: loop exit
PB: predicated region body
PF: predicated region fallthrough
CT: control target
= control target key end

     0   :  { %14 = vsyncpa [#allocation3], 0  ;;  %s2058_s0 = inlined_call_operand.vmem [shape: f32[8,64], index: 0, kind: input, shape index: {}]   ;;  %s2059_s1 = inlined_call_operand.hbm [shape: bf16[64,512], index: 1, kind: input, shape index: {}]   ;;  %s2060_s2 = inlined_call_operand.vmem [shape: f32[1,512], index: 2, kind: input, shape index: {}]   ;;  %s2061_s3 = inlined_call_operand.hbm [shape: bf16[512,512], index: 3, kind: input, shape index: {}]   ;;  %s2062_s4 = inlined_call_operand.vmem [shape: f32[1,512], index: 4, kind: input, shape index: {}]   ;;  %s2063_s5 = inlined_call_operand.hbm [shape: bf16[512,128], index: 5, kind: input, shape index: {}]   ;;  %s2064_s6 = inlined_call_operand.vmem [shape: f32[1,128], index: 6, kind: input, shape index: {}]   ;;  %s2065_s7 = inlined_call_operand.vmem [shape: f32[1,128], index: 7, kind: input, shape index: {}]   ;;  %s2066_s8 = inlined_call_operand.vmem [shape: f32[1,128], index: 8, kind: input, shape index: {}]   ;;  %s2067_s9 = inlined_call_operand.vmem [shape: f32[8,128], index: 9, kind: output, shape index: {}]  }
   0x1   :  { %15 = vsyncpa [#allocation5], 0  ;;  %s37_s11 = sshll.u32 %s2061_s3, 4  ;;  %s1425_s12 = smov [#allocation4]   ;;  %s38_s11 = int_to_ptr.hbm [resolvable:$true] %s37_s11 }
   0x2   :  { %s39_s13 = sshll.u32 %s1425_s12, 4  ;;  %s22_s16 = sshll.u32 %s2059_s1, 4  ;;  %s40_s13 = int_to_ptr.vmem [resolvable:$true] %s39_s13  ;;  %s23_s16 = int_to_ptr.hbm [resolvable:$true] %s22_s16 }
   0x3   :  { %s1426_s17 = smov 256   ;;  %s1427_s18 = smov 16  }
   0x4   :  { %45 = dma.hbm_to_vmem [thread:$0]  %s38_s11, 16384, %s40_s13, [#allocation5], %s1426_s17, %s1426_s17, %s1427_s18  }
   0x5   :  { %s1428_s19 = smov [#allocation2]   ;;  %s52_s23 = sshll.u32 %s2063_s5, 4  ;;  %s53_s23 = int_to_ptr.hbm [resolvable:$true] %s52_s23 }
   0x6   :  { %s24_s20 = sshll.u32 %s1428_s19, 4  ;;  %s1429_s3 = smov [#allocation6]   ;;  %s25_s20 = int_to_ptr.vmem [resolvable:$true] %s24_s20 }
   0x7   :  { %30 = dma.hbm_to_vmem [thread:$0]  %s23_s16, 2048, %s25_s20, [#allocation3], %s1426_s17, %s1426_s17, %s1427_s18  }
   0x8   :  { %s54_s24 = sshll.u32 %s1429_s3, 4  ;;  %s1430_s25 = smov 64   ;;  %s55_s24 = int_to_ptr.vmem [resolvable:$true] %s54_s24 }
   0x9   :  { %s1431_s26 = smov 4  }
   0xa   :  { %60 = dma.hbm_to_vmem [thread:$0]  %s53_s23, 4096, %s55_s24, [#allocation5], %s1430_s25, %s1430_s25, %s1431_s26  }
   0xb   :  { %1421 = dma.done.wait [#allocation3], 2048  }
   0xc   :  { %1422 = vsyncadd [#allocation3], 4294965248 }
   0xd   :  { %1423 = dma.done.wait [#allocation5], 20480  }
   0xe   :  { %1424 = vsyncadd [#allocation5], 4294946816  ;;  %v94_v0 = vld [vmem:[#allocation2 + $0x70] sm:$0xff]  ;;  %v95_v1 = vld [vmem:[#allocation2 + $0x78] sm:$0xff]  ;;  %vm138_vm0 = vcmask 523264  }
   0xf   :  { %v92_v2 = vld [vmem:[#allocation2 + $0x60] sm:$0xff]  ;;  %v124_v3 = vunpack.c.l.bf16 %v94_v0  ;;  %v125_v4 = vunpack.c.h.bf16 %v94_v0  ;;  %v126_v5 = vunpack.c.l.bf16 %v95_v1  ;;  %v127_v6 = vunpack.c.h.bf16 %v95_v1  ;;  %v93_v7 = vld [vmem:[#allocation2 + $0x68] sm:$0xff]  ;;  %v90_v8 = vld [vmem:[#allocation2 + $0x50] sm:$0xff] }
  0x10   :  { %v91_v9 = vld [vmem:[#allocation2 + $0x58] sm:$0xff]  ;;  %v120_v10 = vunpack.c.l.bf16 %v92_v2  ;;  %v121_v11 = vunpack.c.h.bf16 %v92_v2  ;;  %v122_v12 = vunpack.c.l.bf16 %v93_v7  ;;  %v123_v13 = vunpack.c.h.bf16 %v93_v7  ;;  %v88_v14 = vld [vmem:[#allocation2 + $0x40] sm:$0xff]  ;;  %v89_v17 = vld [vmem:[#allocation2 + $0x48] sm:$0xff] }
  0x11   :  { %150 = vmatpush.msra.mxu0 %v124_v3  ;;  %170 = vmatpush.msra.mxu1 %v125_v4  ;;  %v116_v15 = vunpack.c.l.bf16 %v90_v8  ;;  %v117_v16 = vunpack.c.h.bf16 %v90_v8  ;;  %v118_v18 = vunpack.c.l.bf16 %v91_v9  ;;  %v119_v19 = vunpack.c.h.bf16 %v91_v9  ;;  %v86_v20 = vld [vmem:[#allocation2 + $0x30] sm:$0xff]  ;;  %v87_v23 = vld [vmem:[#allocation2 + $0x38] sm:$0xff]  ;;  %v84_v26 = vld [vmem:[#allocation2 + $0x20] sm:$0xff] }
  0x12   :  { %190 = vmatpush.msra.mxu2 %v126_v5  ;;  %210 = vmatpush.msra.mxu3 %v127_v6  ;;  %v112_v21 = vunpack.c.l.bf16 %v88_v14  ;;  %v113_v22 = vunpack.c.h.bf16 %v88_v14  ;;  %v114_v24 = vunpack.c.l.bf16 %v89_v17  ;;  %v115_v25 = vunpack.c.h.bf16 %v89_v17  ;;  %v85_v29 = vld [vmem:[#allocation2 + $0x28] sm:$0xff]  ;;  %v82_v32 = vld [vmem:[#allocation2 + $0x10] sm:$0xff]  ;;  %v83_v35 = vld [vmem:[#allocation2 + $0x18] sm:$0xff] }
  0x13   :  { %151 = vmatpush.msra.mxu0 %v120_v10  ;;  %171 = vmatpush.msra.mxu1 %v121_v11  ;;  %v108_v27 = vunpack.c.l.bf16 %v86_v20  ;;  %v109_v28 = vunpack.c.h.bf16 %v86_v20  ;;  %v110_v30 = vunpack.c.l.bf16 %v87_v23  ;;  %v111_v31 = vunpack.c.h.bf16 %v87_v23  ;;  %v80_v38 = vld [vmem:[#allocation2] sm:$0xff]  ;;  %v81_v41 = vld [vmem:[#allocation2 + $0x8] sm:$0xff]  ;;  %v1491_v48 = vld [vmem:[#allocation4 + $0xf0] sm:$0xff] }
  0x14   :  { %191 = vmatpush.msra.mxu2 %v122_v12  ;;  %211 = vmatpush.msra.mxu3 %v123_v13  ;;  %v104_v33 = vunpack.c.l.bf16 %v84_v26  ;;  %v105_v34 = vunpack.c.h.bf16 %v84_v26  ;;  %v106_v36 = vunpack.c.l.bf16 %v85_v29  ;;  %v107_v37 = vunpack.c.h.bf16 %v85_v29  ;;  %v1493_v49 = vld [vmem:[#allocation4 + $0x1f0] sm:$0xff]  ;;  %v79_v52 = vld [vmem:[%s2058_s0] sm:$0xff] }
  0x15   :  { %152 = vmatpush.msra.mxu0 %v116_v15  ;;  %172 = vmatpush.msra.mxu1 %v117_v16  ;;  %v100_v39 = vunpack.c.l.bf16 %v82_v32  ;;  %v101_v40 = vunpack.c.h.bf16 %v82_v32  ;;  %v102_v42 = vunpack.c.l.bf16 %v83_v35  ;;  %v103_v43 = vunpack.c.h.bf16 %v83_v35  ;;  %v1495_v50 = vld [vmem:[#allocation4 + $0x2f0] sm:$0xff]  ;;  %v1502_v53 = vld [vmem:[#allocation4 + $0xe0] sm:$0xff] }
  0x16   :  { %192 = vmatpush.msra.mxu2 %v118_v18  ;;  %212 = vmatpush.msra.mxu3 %v119_v19  ;;  %v96_v44 = vunpack.c.l.bf16 %v80_v38  ;;  %v97_v45 = vunpack.c.h.bf16 %v80_v38  ;;  %v98_v46 = vunpack.c.l.bf16 %v81_v41  ;;  %v99_v47 = vunpack.c.h.bf16 %v81_v41  ;;  %v1497_v51 = vld [vmem:[#allocation4 + $0x3f0] sm:$0xff]  ;;  %v1504_v54 = vld [vmem:[#allocation4 + $0x1e0] sm:$0xff] }
  0x17   :  { %153 = vmatpush.msra.mxu0 %v112_v21  ;;  %173 = vmatpush.msra.mxu1 %v113_v22  ;;  %v414_v55 = vunpack.c.l.bf16 %v1491_v48  ;;  %v478_v56 = vunpack.c.l.bf16 %v1493_v49  ;;  %v1508_v57 = vld [vmem:[#allocation4 + $0x2e0] sm:$0xff]  ;;  %v1512_v59 = vld [vmem:[#allocation4 + $0xd0] sm:$0xff]  ;;  %v542_v61 = vunpack.c.l.bf16 %v1495_v50  ;;  %v606_v62 = vunpack.c.l.bf16 %v1497_v51 }
  0x18   :  { %193 = vmatpush.msra.mxu2 %v114_v24  ;;  %213 = vmatpush.msra.mxu3 %v115_v25  ;;  %v1510_v58 = vld [vmem:[#allocation4 + $0x3e0] sm:$0xff]  ;;  %v1514_v60 = vld [vmem:[#allocation4 + $0x1d0] sm:$0xff]  ;;  %v410_v63 = vunpack.c.l.bf16 %v1502_v53  ;;  %v474_v0 = vunpack.c.l.bf16 %v1504_v54  ;;  %v538_v5 = vunpack.c.l.bf16 %v1508_v57  ;;  %v406_v7 = vunpack.c.l.bf16 %v1512_v59 }
  0x19   :  { %154 = vmatpush.msra.mxu0 %v108_v27  ;;  %174 = vmatpush.msra.mxu1 %v109_v28  ;;  %v1522_v1 = vld [vmem:[#allocation4 + $0x2d0] sm:$0xff]  ;;  %v1528_v3 = vld [vmem:[#allocation4 + $0xc0] sm:$0xff]  ;;  %v602_v6 = vunpack.c.l.bf16 %v1510_v58  ;;  %v470_v8 = vunpack.c.l.bf16 %v1514_v60 }
  0x1a   :  { %194 = vmatpush.msra.mxu2 %v110_v30  ;;  %214 = vmatpush.msra.mxu3 %v111_v31  ;;  %v1524_v2 = vld [vmem:[#allocation4 + $0x3d0] sm:$0xff]  ;;  %v1530_v4 = vld [vmem:[#allocation4 + $0x1c0] sm:$0xff]  ;;  %v534_v13 = vunpack.c.l.bf16 %v1522_v1  ;;  %v402_v15 = vunpack.c.l.bf16 %v1528_v3 }
  0x1b   :  { %155 = vmatpush.msra.mxu0 %v104_v33  ;;  %175 = vmatpush.msra.mxu1 %v105_v34  ;;  %v1536_v9 = vld [vmem:[#allocation4 + $0x2c0] sm:$0xff]  ;;  %v1540_v11 = vld [vmem:[#allocation4 + $0xb0] sm:$0xff]  ;;  %v598_v14 = vunpack.c.l.bf16 %v1524_v2  ;;  %v466_v16 = vunpack.c.l.bf16 %v1530_v4 }
  0x1c   :  { %195 = vmatpush.msra.mxu2 %v106_v36  ;;  %215 = vmatpush.msra.mxu3 %v107_v37  ;;  %v1538_v10 = vld [vmem:[#allocation4 + $0x3c0] sm:$0xff]  ;;  %v1542_v12 = vld [vmem:[#allocation4 + $0x1b0] sm:$0xff]  ;;  %v530_v21 = vunpack.c.l.bf16 %v1536_v9  ;;  %v398_v23 = vunpack.c.l.bf16 %v1540_v11 }
  0x1d   :  { %156 = vmatpush.msra.mxu0 %v100_v39  ;;  %176 = vmatpush.msra.mxu1 %v101_v40  ;;  %v1548_v17 = vld [vmem:[#allocation4 + $0x2b0] sm:$0xff]  ;;  %v1552_v19 = vld [vmem:[#allocation4 + $0xa0] sm:$0xff]  ;;  %v594_v22 = vunpack.c.l.bf16 %v1538_v10  ;;  %v462_v24 = vunpack.c.l.bf16 %v1542_v12 }
  0x1e   :  { %196 = vmatpush.msra.mxu2 %v102_v42  ;;  %216 = vmatpush.msra.mxu3 %v103_v43  ;;  %v1550_v18 = vld [vmem:[#allocation4 + $0x3b0] sm:$0xff]  ;;  %v1554_v20 = vld [vmem:[#allocation4 + $0x1a0] sm:$0xff]  ;;  %v526_v29 = vunpack.c.l.bf16 %v1548_v17  ;;  %v394_v33 = vunpack.c.l.bf16 %v1552_v19 }
  0x1f   :  { %157 = vmatpush.msra.mxu0 %v96_v44  ;;  %177 = vmatpush.msra.mxu1 %v97_v45  ;;  %v1560_v25 = vld [vmem:[#allocation4 + $0x90] sm:$0xff]  ;;  %v1562_v26 = vld [vmem:[#allocation4 + $0x2a0] sm:$0xff]  ;;  %v590_v30 = vunpack.c.l.bf16 %v1550_v18  ;;  %v458_v34 = vunpack.c.l.bf16 %v1554_v20 }
  0x20   :  { %197 = vmatpush.msra.mxu2 %v98_v46  ;;  %217 = vmatpush.msra.mxu3 %v99_v47  ;;  %v1564_v27 = vld [vmem:[#allocation4 + $0x3a0] sm:$0xff]  ;;  %v1566_v28 = vld [vmem:[#allocation4 + $0x190] sm:$0xff]  ;;  %v522_v37 = vunpack.c.l.bf16 %v1562_v26  ;;  %v390_v39 = vunpack.c.l.bf16 %v1560_v25 }
  0x21   :  { %1176 = vmatmul.msk.f32.vlgmr.msra.gmra.mxu0 %vm138_vm0, %v79_v52  ;;  %1177 = vmatmul.msk.f32.vlgmr.msra.gmra.mxu1 %vm138_vm0, %v79_v52  ;;  %v1570_v31 = vld [vmem:[#allocation4 + $0x290] sm:$0xff]  ;;  %v1576_v35 = vld [vmem:[#allocation4 + $0x80] sm:$0xff]  ;;  %v586_v38 = vunpack.c.l.bf16 %v1564_v27  ;;  %v454_v40 = vunpack.c.l.bf16 %v1566_v28 }
  0x22   :  { %1178 = vmatmul.msk.f32.vlgmr.msra.gmra.mxu2 %vm138_vm0, %v79_v52  ;;  %1179 = vmatmul.msk.f32.vlgmr.msra.gmra.mxu3 %vm138_vm0, %v79_v52  ;;  %v1572_v32 = vld [vmem:[#allocation4 + $0x390] sm:$0xff]  ;;  %v1578_v36 = vld [vmem:[#allocation4 + $0x180] sm:$0xff]  ;;  %v518_v45 = vunpack.c.l.bf16 %v1570_v31  ;;  %v386_v47 = vunpack.c.l.bf16 %v1576_v35 }
  0x23   :  { %620 = vmatpush.msrb.mxu0 %v414_v55  ;;  %640 = vmatpush.msrb.mxu1 %v478_v56  ;;  %v1584_v41 = vld [vmem:[#allocation4 + $0x280] sm:$0xff]  ;;  %v1588_v43 = vld [vmem:[#allocation4 + $0x70] sm:$0xff]  ;;  %v582_v46 = vunpack.c.l.bf16 %v1572_v32  ;;  %v450_v52 = vunpack.c.l.bf16 %v1578_v36 }
  0x24   :  { %660 = vmatpush.msrb.mxu2 %v542_v61  ;;  %680 = vmatpush.msrb.mxu3 %v606_v62  ;;  %v1586_v42 = vld [vmem:[#allocation4 + $0x380] sm:$0xff]  ;;  %v1590_v44 = vld [vmem:[#allocation4 + $0x170] sm:$0xff] }
  0x25   :  { %621 = vmatpush.msrb.mxu0 %v410_v63  ;;  %641 = vmatpush.msrb.mxu1 %v474_v0  ;;  %v1596_v55 = vld [vmem:[#allocation4 + $0x270] sm:$0xff]  ;;  %v1600_v61 = vld [vmem:[#allocation4 + $0x60] sm:$0xff]  ;;  %v514_v63 = vunpack.c.l.bf16 %v1584_v41  ;;  %v578_v0 = vunpack.c.l.bf16 %v1586_v42 }
  0x26   :  { %661 = vmatpush.msrb.mxu2 %v538_v5  ;;  %681 = vmatpush.msrb.mxu3 %v602_v6  ;;  %v1598_v56 = vld [vmem:[#allocation4 + $0x370] sm:$0xff]  ;;  %v1602_v62 = vld [vmem:[#allocation4 + $0x160] sm:$0xff]  ;;  %v382_v5 = vunpack.c.l.bf16 %v1588_v43  ;;  %v446_v6 = vunpack.c.l.bf16 %v1590_v44 }
  0x27   :  { %622 = vmatpush.msrb.mxu0 %v406_v7  ;;  %642 = vmatpush.msrb.mxu1 %v470_v8  ;;  %v1608_v7 = vld [vmem:[#allocation4 + $0x260] sm:$0xff] }
  0x28   :  { %662 = vmatpush.msrb.mxu2 %v534_v13  ;;  %682 = vmatpush.msrb.mxu3 %v598_v14  ;;  %v1610_v8 = vld [vmem:[#allocation4 + $0x360] sm:$0xff]  ;;  %v1612_v13 = vld [vmem:[#allocation4 + $0x50] sm:$0xff] }
  0x29   :  { %623 = vmatpush.msrb.mxu0 %v402_v15  ;;  %643 = vmatpush.msrb.mxu1 %v466_v16  ;;  %v1614_v14 = vld [vmem:[#allocation4 + $0x150] sm:$0xff]  ;;  %v510_v15 = vunpack.c.l.bf16 %v1596_v55  ;;  %v574_v16 = vunpack.c.l.bf16 %v1598_v56 }
  0x2a   :  { %663 = vmatpush.msrb.mxu2 %v530_v21  ;;  %683 = vmatpush.msrb.mxu3 %v594_v22  ;;  %v378_v21 = vunpack.c.l.bf16 %v1600_v61  ;;  %v442_v22 = vunpack.c.l.bf16 %v1602_v62 }
  0x2b   :  { %624 = vmatpush.msrb.mxu0 %v398_v23  ;;  %644 = vmatpush.msrb.mxu1 %v462_v24  ;;  %v1620_v23 = vld [vmem:[#allocation4 + $0x250] sm:$0xff] }
  0x2c   :  { %664 = vmatpush.msrb.mxu2 %v526_v29  ;;  %684 = vmatpush.msrb.mxu3 %v590_v30  ;;  %2097 = vst [vmem:[#allocation9_spill] sm:$0xff] %v1620_v23  ;;  %v1622_v24 = vld [vmem:[#allocation4 + $0x350] sm:$0xff]  ;;  %v1624_v29 = vld [vmem:[#allocation4 + $0x40] sm:$0xff] }
  0x2d   :  { %625 = vmatpush.msrb.mxu0 %v394_v33  ;;  %645 = vmatpush.msrb.mxu1 %v458_v34  ;;  %2098 = vst [vmem:[#allocation10_spill] sm:$0xff] %v1622_v24  ;;  %v1626_v30 = vld [vmem:[#allocation4 + $0x140] sm:$0xff]  ;;  %v506_v33 = vunpack.c.l.bf16 %v1608_v7  ;;  %v570_v34 = vunpack.c.l.bf16 %v1610_v8 }
  0x2e   :  { %665 = vmatpush.msrb.mxu2 %v522_v37  ;;  %685 = vmatpush.msrb.mxu3 %v586_v38  ;;  %2099 = vst [vmem:[#allocation11_spill] sm:$0xff] %v1624_v29  ;;  %v374_v37 = vunpack.c.l.bf16 %v1612_v13  ;;  %v438_v38 = vunpack.c.l.bf16 %v1614_v14 }
  0x2f   :  { %626 = vmatpush.msrb.mxu0 %v390_v39  ;;  %646 = vmatpush.msrb.mxu1 %v454_v40  ;;  %2100 = vst [vmem:[#allocation12_spill] sm:$0xff] %v1626_v30  ;;  %v1632_v39 = vld [vmem:[#allocation4 + $0x240] sm:$0xff] }
  0x30   :  { %666 = vmatpush.msrb.mxu2 %v518_v45  ;;  %686 = vmatpush.msrb.mxu3 %v582_v46  ;;  %2101 = vst [vmem:[#allocation13_spill] sm:$0xff] %v1632_v39  ;;  %v1634_v40 = vld [vmem:[#allocation4 + $0x340] sm:$0xff]  ;;  %v1636_v45 = vld [vmem:[#allocation4 + $0x30] sm:$0xff] }
  0x31   :  { %627 = vmatpush.msrb.mxu0 %v386_v47  ;;  %647 = vmatpush.msrb.mxu1 %v450_v52  ;;  %2102 = vst [vmem:[#allocation14_spill] sm:$0xff] %v1634_v40  ;;  %v1638_v46 = vld [vmem:[#allocation4 + $0x130] sm:$0xff]  ;;  %v502_v47 = vunpack.c.l.bf16 %v1620_v23  ;;  %v566_v52 = vunpack.c.l.bf16 %v1622_v24  ;;  %v498_v23 = vunpack.c.l.bf16 %v1632_v39  ;;  %v562_v24 = vunpack.c.l.bf16 %v1634_v40 }
  0x32   :  { %667 = vmatpush.msrb.mxu2 %v514_v63  ;;  %687 = vmatpush.msrb.mxu3 %v578_v0  ;;  %2103 = vst [vmem:[#allocation15_spill] sm:$0xff] %v1636_v45  ;;  %v370_v63 = vunpack.c.l.bf16 %v1624_v29  ;;  %v434_v0 = vunpack.c.l.bf16 %v1626_v30  ;;  %v1656_v30 = vld [vmem:[#allocation4 + $0x220] sm:$0xff] }
  0x33   :  { %628 = vmatpush.msrb.mxu0 %v382_v5  ;;  %648 = vmatpush.msrb.mxu1 %v446_v6  ;;  %2104 = vst [vmem:[#allocation16_spill] sm:$0xff] %v1638_v46  ;;  %v1644_v5 = vld [vmem:[#allocation4 + $0x230] sm:$0xff]  ;;  %v1658_v29 = vld [vmem:[#allocation4 + $0x320] sm:$0xff] }
  0x34   :  { %668 = vmatpush.msrb.mxu2 %v510_v15  ;;  %688 = vmatpush.msrb.mxu3 %v574_v16  ;;  %2105 = vst [vmem:[#allocation17_spill] sm:$0xff] %v1644_v5  ;;  %v1646_v6 = vld [vmem:[#allocation4 + $0x330] sm:$0xff]  ;;  %v1648_v15 = vld [vmem:[#allocation4 + $0x20] sm:$0xff]  ;;  %v494_v39 = vunpack.c.l.bf16 %v1644_v5  ;;  %v490_v5 = vunpack.c.l.bf16 %v1656_v30 }
  0x35   :  { %629 = vmatpush.msrb.mxu0 %v378_v21  ;;  %649 = vmatpush.msrb.mxu1 %v442_v22  ;;  %2106 = vst [vmem:[#allocation18_spill] sm:$0xff] %v1646_v6  ;;  %v1650_v16 = vld [vmem:[#allocation4 + $0x120] sm:$0xff]  ;;  %v366_v21 = vunpack.c.l.bf16 %v1636_v45  ;;  %v430_v22 = vunpack.c.l.bf16 %v1638_v46  ;;  %v558_v40 = vunpack.c.l.bf16 %v1646_v6  ;;  %v1668_v46 = vld [vmem:[#allocation4 + $0x210] sm:$0xff]  ;;  %v554_v6 = vunpack.c.l.bf16 %v1658_v29 }
  0x36   :  { %669 = vmatpush.msrb.mxu2 %v506_v33  ;;  %689 = vmatpush.msrb.mxu3 %v570_v34  ;;  %2107 = vst [vmem:[#allocation19_spill] sm:$0xff] %v1648_v15  ;;  %v1660_v33 = vld [vmem:[#allocation4 + $0x10] sm:$0xff] }
  0x37   :  { %2108 = vst [vmem:[#allocation20_spill] sm:$0xff] %v1650_v16  ;;  %630 = vmatpush.msrb.mxu0 %v374_v37  ;;  %650 = vmatpush.msrb.mxu1 %v438_v38  ;;  %v1662_v34 = vld [vmem:[#allocation4 + $0x110] sm:$0xff]  ;;  %v362_v37 = vunpack.c.l.bf16 %v1648_v15  ;;  %v426_v38 = vunpack.c.l.bf16 %v1650_v16  ;;  %v486_v16 = vunpack.c.l.bf16 %v1668_v46  ;;  %v1684_v15 = vld [vmem:[#allocation4 + $0x300] sm:$0xff] }
  0x38   :  { %2109 = vst [vmem:[#allocation21_spill] sm:$0xff] %v1656_v30  ;;  %670 = vmatpush.msrb.mxu2 %v502_v47  ;;  %690 = vmatpush.msrb.mxu3 %v566_v52  ;;  %v1670_v45 = vld [vmem:[#allocation4 + $0x310] sm:$0xff]  ;;  %v1672_v47 = vld [vmem:[#allocation4] sm:$0xff]  ;;  %v479_v30 = vunpack.c.h.bf16 %v1493_v49  ;;  %v407_v49 = vunpack.c.h.bf16 %v1512_v59  ;;  %v599_v59 = vunpack.c.h.bf16 %v1524_v2  ;;  %v527_v2 = vunpack.c.h.bf16 %v1548_v17 }
  0x39   :  { %2110 = vst [vmem:[#allocation22_spill] sm:$0xff] %v1658_v29  ;;  %631 = vmatpush.msrb.mxu0 %v370_v63  ;;  %651 = vmatpush.msrb.mxu1 %v434_v0  ;;  %v1674_v52 = vld [vmem:[#allocation4 + $0x100] sm:$0xff]  ;;  %v358_v63 = vunpack.c.l.bf16 %v1660_v33  ;;  %v422_v0 = vunpack.c.l.bf16 %v1662_v34  ;;  %v354_v29 = vunpack.c.l.bf16 %v1672_v47  ;;  %v451_v17 = vunpack.c.h.bf16 %v1578_v36 }
  0x3a   :  { %2111 = vst [vmem:[#allocation23_spill] sm:$0xff] %v1670_v45  ;;  %671 = vmatpush.msrb.mxu2 %v498_v23  ;;  %691 = vmatpush.msrb.mxu3 %v562_v24  ;;  %v550_v23 = vunpack.c.l.bf16 %v1670_v45  ;;  %v1682_v24 = vld [vmem:[#allocation4 + $0x200] sm:$0xff]  ;;  %v411_v45 = vunpack.c.h.bf16 %v1502_v53  ;;  %v603_v53 = vunpack.c.h.bf16 %v1510_v58  ;;  %v531_v58 = vunpack.c.h.bf16 %v1536_v9 }
  0x3b   :  { %632 = vmatpush.msrb.mxu0 %v366_v21  ;;  %652 = vmatpush.msrb.mxu1 %v430_v22  ;;  %v418_v21 = vunpack.c.l.bf16 %v1674_v52  ;;  %v415_v22 = vunpack.c.h.bf16 %v1491_v48  ;;  %v607_v48 = vunpack.c.h.bf16 %v1497_v51  ;;  %v535_v51 = vunpack.c.h.bf16 %v1522_v1 }
  0x3c   :  { %672 = vmatpush.msrb.mxu2 %v494_v39  ;;  %692 = vmatpush.msrb.mxu3 %v558_v40  ;;  %v482_v39 = vunpack.c.l.bf16 %v1682_v24  ;;  %v546_v40 = vunpack.c.l.bf16 %v1684_v15  ;;  %v459_v1 = vunpack.c.h.bf16 %v1554_v20  ;;  %v455_v9 = vunpack.c.h.bf16 %v1566_v28 }
  0x3d   :  { %633 = vmatpush.msrb.mxu0 %v362_v37  ;;  %653 = vmatpush.msrb.mxu1 %v426_v38  ;;  %v475_v37 = vunpack.c.h.bf16 %v1504_v54  ;;  %v543_v38 = vunpack.c.h.bf16 %v1495_v50  ;;  %v403_v54 = vunpack.c.h.bf16 %v1528_v3  ;;  %v467_v50 = vunpack.c.h.bf16 %v1530_v4 }
  0x3e   :  { %673 = vmatpush.msrb.mxu2 %v490_v5  ;;  %693 = vmatpush.msrb.mxu3 %v554_v6  ;;  %v471_v5 = vunpack.c.h.bf16 %v1514_v60  ;;  %v539_v6 = vunpack.c.h.bf16 %v1508_v57  ;;  %v399_v60 = vunpack.c.h.bf16 %v1540_v11  ;;  %v463_v57 = vunpack.c.h.bf16 %v1542_v12 }
  0x3f   :  { %634 = vmatpush.msrb.mxu0 %v358_v63  ;;  %654 = vmatpush.msrb.mxu1 %v422_v0  ;;  %v595_v3 = vunpack.c.h.bf16 %v1538_v10  ;;  %v395_v4 = vunpack.c.h.bf16 %v1552_v19  ;;  %v591_v11 = vunpack.c.h.bf16 %v1550_v18  ;;  %v391_v12 = vunpack.c.h.bf16 %v1560_v25  ;;  %v2117_v0 = vld [vmem:[#allocation16_spill] sm:$0xff] }
  0x40   :  { %674 = vmatpush.msrb.mxu2 %v486_v16  ;;  %694 = vmatpush.msrb.mxu3 %v550_v23  ;;  %v523_v10 = vunpack.c.h.bf16 %v1562_v26  ;;  %v587_v19 = vunpack.c.h.bf16 %v1564_v27  ;;  %v387_v20 = vunpack.c.h.bf16 %v1576_v35  ;;  %v519_v18 = vunpack.c.h.bf16 %v1570_v31  ;;  %v2115_v16 = vld [vmem:[#allocation10_spill] sm:$0xff] }
  0x41   :  { %635 = vmatpush.msrb.mxu0 %v354_v29  ;;  %655 = vmatpush.msrb.mxu1 %v418_v21  ;;  %v583_v25 = vunpack.c.h.bf16 %v1572_v32  ;;  %v383_v28 = vunpack.c.h.bf16 %v1588_v43  ;;  %v447_v26 = vunpack.c.h.bf16 %v1590_v44  ;;  %v515_v27 = vunpack.c.h.bf16 %v1584_v41  ;;  %v2119_v21 = vld [vmem:[#allocation14_spill] sm:$0xff] }
  0x42   :  { %675 = vmatpush.msrb.mxu2 %v482_v39  ;;  %695 = vmatpush.msrb.mxu3 %v546_v40  ;;  %v579_v35 = vunpack.c.h.bf16 %v1586_v42  ;;  %v379_v36 = vunpack.c.h.bf16 %v1600_v61  ;;  %v443_v31 = vunpack.c.h.bf16 %v1602_v62  ;;  %v511_v32 = vunpack.c.h.bf16 %v1596_v55  ;;  %v2112_v62 = vld [vmem:[#allocation11_spill] sm:$0xff] }
  0x43   :  { %700 = vmatpush.msra.mxu0 %v415_v22  ;;  %720 = vmatpush.msra.mxu1 %v479_v30  ;;  %v575_v43 = vunpack.c.h.bf16 %v1598_v56  ;;  %v375_v44 = vunpack.c.h.bf16 %v1612_v13  ;;  %v439_v41 = vunpack.c.h.bf16 %v1614_v14  ;;  %v507_v42 = vunpack.c.h.bf16 %v1608_v7  ;;  %v2113_v30 = vld [vmem:[#allocation12_spill] sm:$0xff]  ;;  %v2114_v56 = vld [vmem:[#allocation9_spill] sm:$0xff]  ;;  %v2116_v14 = vld [vmem:[#allocation15_spill] sm:$0xff] }
  0x44   :  { %740 = vmatpush.msra.mxu2 %v543_v38  ;;  %760 = vmatpush.msra.mxu3 %v607_v48  ;;  %v571_v61 = vunpack.c.h.bf16 %v1610_v8  ;;  %v371_v29 = vunpack.c.h.bf16 %v2112_v62  ;;  %v435_v55 = vunpack.c.h.bf16 %v2113_v30  ;;  %v567_v13 = vunpack.c.h.bf16 %v2115_v16  ;;  %v2118_v8 = vld [vmem:[#allocation13_spill] sm:$0xff]  ;;  %v2120_v39 = vld [vmem:[#allocation19_spill] sm:$0xff]  ;;  %v1785_v62 = vld [vmem:[#allocation4 + $0x2f8] sm:$0xff] }
  0x45   :  { %701 = vmatpush.msra.mxu0 %v411_v45  ;;  %721 = vmatpush.msra.mxu1 %v475_v37  ;;  %v503_v45 = vunpack.c.h.bf16 %v2114_v56  ;;  %v367_v63 = vunpack.c.h.bf16 %v2116_v14  ;;  %v431_v7 = vunpack.c.h.bf16 %v2117_v0  ;;  %v499_v23 = vunpack.c.h.bf16 %v2118_v8  ;;  %v2121_v37 = vld [vmem:[#allocation20_spill] sm:$0xff]  ;;  %v2122_v48 = vld [vmem:[#allocation17_spill] sm:$0xff]  ;;  %v1795_v14 = vld [vmem:[#allocation4 + $0x2e8] sm:$0xff] }
  0x46   :  { %741 = vmatpush.msra.mxu2 %v539_v6  ;;  %761 = vmatpush.msra.mxu3 %v603_v53  ;;  %v563_v22 = vunpack.c.h.bf16 %v2119_v21  ;;  %v363_v40 = vunpack.c.h.bf16 %v2120_v39  ;;  %v427_v38 = vunpack.c.h.bf16 %v2121_v37  ;;  %v359_v53 = vunpack.c.h.bf16 %v1660_v33  ;;  %v1789_v56 = vld [vmem:[#allocation4 + $0x1b8] sm:$0xff]  ;;  %v1808_v39 = vld [vmem:[#allocation4 + $0x1a8] sm:$0xff] }
  0x47   :  { %702 = vmatpush.msra.mxu0 %v407_v49  ;;  %722 = vmatpush.msra.mxu1 %v471_v5  ;;  %v495_v49 = vunpack.c.h.bf16 %v2122_v48  ;;  %v2123_v5 = vld [vmem:[#allocation18_spill] sm:$0xff]  ;;  %v464_v21 = vunpack.c.l.bf16 %v1789_v56  ;;  %v540_v37 = vunpack.c.l.bf16 %v1795_v14  ;;  %v1816_v48 = vld [vmem:[#allocation4 + $0x3d8] sm:$0xff] }
  0x48   :  { %742 = vmatpush.msra.mxu2 %v535_v51  ;;  %762 = vmatpush.msra.mxu3 %v599_v59  ;;  %v559_v6 = vunpack.c.h.bf16 %v2123_v5  ;;  %v2125_v59 = vld [vmem:[#allocation22_spill] sm:$0xff]  ;;  %v1819_v5 = vld [vmem:[#allocation4 + $0x98] sm:$0xff] }
  0x49   :  { %703 = vmatpush.msra.mxu0 %v403_v54  ;;  %723 = vmatpush.msra.mxu1 %v467_v50  ;;  %v423_v54 = vunpack.c.h.bf16 %v1662_v34  ;;  %v2124_v50 = vld [vmem:[#allocation21_spill] sm:$0xff]  ;;  %v483_v34 = vunpack.c.h.bf16 %v1682_v24 }
  0x4a   :  { %743 = vmatpush.msra.mxu2 %v531_v58  ;;  %763 = vmatpush.msra.mxu3 %v595_v3  ;;  %v491_v51 = vunpack.c.h.bf16 %v2124_v50  ;;  %v419_v58 = vunpack.c.h.bf16 %v1674_v52  ;;  %v487_v3 = vunpack.c.h.bf16 %v1668_v46  ;;  %v128_v46 = vld [vmem:[%s2060_s2] sm:$0xf]  ;;  %v1825_v50 = vld [vmem:[#allocation4 + $0x2c8] sm:$0xff] }
  0x4b   :  { %704 = vmatpush.msra.mxu0 %v399_v60  ;;  %724 = vmatpush.msra.mxu1 %v463_v57  ;;  %v555_v60 = vunpack.c.h.bf16 %v2125_v59  ;;  %v355_v57 = vunpack.c.h.bf16 %v1672_v47  ;;  %v130_v47 = vperm.slane %v128_v46, 0  ;;  %v131_v52 = vperm.slane %v128_v46, 1 }
  0x4c   :  { %744 = vmatpush.msra.mxu2 %v527_v2  ;;  %764 = vmatpush.msra.mxu3 %v591_v11  ;;  %v1757_v2 = vld [vmem:[#allocation4 + $0xf8] sm:$0xff] }
  0x4d   :  { %705 = vmatpush.msra.mxu0 %v395_v4  ;;  %725 = vmatpush.msra.mxu1 %v459_v1  ;;  %v2126_v4 = vld [vmem:[#allocation23_spill] sm:$0xff]  ;;  %v547_v1 = vunpack.c.h.bf16 %v1684_v15  ;;  %v1759_v11 = vld [vmem:[#allocation4 + $0x1f8] sm:$0xff] }
  0x4e   :  { %745 = vmatpush.msra.mxu2 %v523_v10  ;;  %765 = vmatpush.msra.mxu3 %v587_v19  ;;  %v551_v33 = vunpack.c.h.bf16 %v2126_v4  ;;  %v1761_v10 = vld [vmem:[#allocation4 + $0xe8] sm:$0xff] }
  0x4f   :  { %706 = vmatpush.msra.mxu0 %v391_v12  ;;  %726 = vmatpush.msra.mxu1 %v455_v9  ;;  %v1763_v19 = vld [vmem:[#allocation4 + $0x1e8] sm:$0xff] }
  0x50   :  { %746 = vmatpush.msra.mxu2 %v519_v18  ;;  %766 = vmatpush.msra.mxu3 %v583_v25  ;;  %v1836_v4 = vld [vmem:[#allocation4 + $0x188] sm:$0xff] }
  0x51   :  { %707 = vmatpush.msra.mxu0 %v387_v20  ;;  %727 = vmatpush.msra.mxu1 %v451_v17  ;;  %v416_v20 = vunpack.c.l.bf16 %v1757_v2  ;;  %v480_v17 = vunpack.c.l.bf16 %v1759_v11 }
  0x52   :  { %747 = vmatpush.msra.mxu2 %v515_v27  ;;  %767 = vmatpush.msra.mxu3 %v579_v35  ;;  %v132_v27 = vperm.slane %v128_v46, 2  ;;  %v133_v35 = vperm.slane %v128_v46, 3  ;;  %v1843_v46 = vld [vmem:[#allocation4 + $0x3b8] sm:$0xff] }
  0x53   :  { %708 = vmatpush.msra.mxu0 %v383_v28  ;;  %728 = vmatpush.msra.mxu1 %v447_v26  ;;  %v1771_v28 = vld [vmem:[#allocation4 + $0xd8] sm:$0xff] }
  0x54   :  { %748 = vmatpush.msra.mxu2 %v511_v32  ;;  %768 = vmatpush.msra.mxu3 %v575_v43  ;;  %v1773_v26 = vld [vmem:[#allocation4 + $0x1d8] sm:$0xff]  ;;  %v408_v32 = vunpack.c.l.bf16 %v1771_v28 }
  0x55   :  { %709 = vmatpush.msra.mxu0 %v379_v36  ;;  %729 = vmatpush.msra.mxu1 %v443_v31  ;;  %v412_v36 = vunpack.c.l.bf16 %v1761_v10  ;;  %v476_v31 = vunpack.c.l.bf16 %v1763_v19  ;;  %v472_v43 = vunpack.c.l.bf16 %v1773_v26 }
  0x56   :  { %749 = vmatpush.msra.mxu2 %v507_v42  ;;  %769 = vmatpush.msra.mxu3 %v571_v61 }
  0x57   :  { %710 = vmatpush.msra.mxu0 %v375_v44  ;;  %730 = vmatpush.msra.mxu1 %v439_v41  ;;  %v1781_v44 = vld [vmem:[#allocation4 + $0xc8] sm:$0xff] }
  0x58   :  { %750 = vmatpush.msra.mxu2 %v503_v45  ;;  %770 = vmatpush.msra.mxu3 %v567_v13  ;;  %v1783_v41 = vld [vmem:[#allocation4 + $0x1c8] sm:$0xff]  ;;  %v404_v45 = vunpack.c.l.bf16 %v1781_v44  ;;  %v1793_v13 = vld [vmem:[#allocation4 + $0xb8] sm:$0xff] }
  0x59   :  { %711 = vmatpush.msra.mxu0 %v371_v29  ;;  %731 = vmatpush.msra.mxu1 %v435_v55  ;;  %v1787_v29 = vld [vmem:[#allocation4 + $0x3f8] sm:$0xff]  ;;  %v468_v16 = vunpack.c.l.bf16 %v1783_v41 }
  0x5a   :  { %751 = vmatpush.msra.mxu2 %v499_v23  ;;  %771 = vmatpush.msra.mxu3 %v563_v22  ;;  %v608_v8 = vunpack.c.l.bf16 %v1787_v29  ;;  %v1803_v23 = vld [vmem:[#allocation4 + $0x3e8] sm:$0xff] }
  0x5b   :  { %712 = vmatpush.msra.mxu0 %v367_v63  ;;  %732 = vmatpush.msra.mxu1 %v431_v7  ;;  %v544_v7 = vunpack.c.l.bf16 %v1785_v62  ;;  %v1806_v22 = vld [vmem:[#allocation4 + $0xa8] sm:$0xff] }
  0x5c   :  { %752 = vmatpush.msra.mxu2 %v495_v49  ;;  %772 = vmatpush.msra.mxu3 %v559_v6  ;;  %v604_v49 = vunpack.c.l.bf16 %v1803_v23  ;;  %v1821_v6 = vld [vmem:[#allocation4 + $0x198] sm:$0xff] }
  0x5d   :  { %713 = vmatpush.msra.mxu0 %v363_v40  ;;  %733 = vmatpush.msra.mxu1 %v427_v38  ;;  %v400_v40 = vunpack.c.l.bf16 %v1793_v13  ;;  %v1814_v38 = vld [vmem:[#allocation4 + $0x2d8] sm:$0xff] }
  0x5e   :  { %753 = vmatpush.msra.mxu2 %v491_v51  ;;  %773 = vmatpush.msra.mxu3 %v555_v60  ;;  %v1827_v51 = vld [vmem:[#allocation4 + $0x3c8] sm:$0xff]  ;;  %v536_v59 = vunpack.c.l.bf16 %v1814_v38  ;;  %v600_v60 = vunpack.c.l.bf16 %v1816_v48 }
  0x5f   :  { %714 = vmatpush.msra.mxu0 %v359_v53  ;;  %734 = vmatpush.msra.mxu1 %v423_v54  ;;  %v396_v53 = vunpack.c.l.bf16 %v1806_v22  ;;  %v460_v54 = vunpack.c.l.bf16 %v1808_v39 }
  0x60   :  { %754 = vmatpush.msra.mxu2 %v487_v3  ;;  %774 = vmatpush.msra.mxu3 %v551_v33  ;;  %v1834_v3 = vld [vmem:[#allocation4 + $0x88] sm:$0xff]  ;;  %v532_v33 = vunpack.c.l.bf16 %v1825_v50 }
  0x61   :  { %715 = vmatpush.msra.mxu0 %v355_v57  ;;  %735 = vmatpush.msra.mxu1 %v419_v58  ;;  %v392_v57 = vunpack.c.l.bf16 %v1819_v5  ;;  %v456_v58 = vunpack.c.l.bf16 %v1821_v6 }
  0x62   :  { %755 = vmatpush.msra.mxu2 %v483_v34  ;;  %775 = vmatpush.msra.mxu3 %v547_v1  ;;  %v596_v34 = vunpack.c.l.bf16 %v1827_v51  ;;  %v1841_v1 = vld [vmem:[#allocation4 + $0x2b8] sm:$0xff] }
  0x9e   :  { %v159_v24 = vpop.f32.mrf.mxu0  ;;  %v179_v15 = vpop.f32.mrf.mxu1 }
  0x9f   :  { %v160_v12 = vadd.f32 %v159_v24, %v130_v47  ;;  %v180_v9 = vadd.f32 %v179_v15, %v131_v52  ;;  %v1845_v47 = vld [vmem:[#allocation4 + $0x78] sm:$0xff]  ;;  %v388_v24 = vunpack.c.l.bf16 %v1834_v3  ;;  %v452_v15 = vunpack.c.l.bf16 %v1836_v4 }
  0xa0   :  { %v1847_v52 = vld [vmem:[#allocation4 + $0x178] sm:$0xff] }
  0xa1   :  { %v1767_v18 = vmax.f32 %v160_v12, 0.0  ;;  %v1769_v25 = vmax.f32 %v180_v9, 0.0  ;;  %v1851_v12 = vld [vmem:[#allocation4 + $0x2a8] sm:$0xff] }
  0xa2   :  { %v1853_v9 = vld [vmem:[#allocation4 + $0x3a8] sm:$0xff] }
  0xa3   :  { %636 = vmatmul.f32.vlgmr.msrb.gmra.mxu0 %v1767_v18  ;;  %656 = vmatmul.f32.vlgmr.msrb.gmra.mxu1 %v1769_v25 }
  0xa4   :  { %780 = vmatpush.msrb.mxu0 %v416_v20  ;;  %800 = vmatpush.msrb.mxu1 %v480_v17  ;;  %v528_v20 = vunpack.c.l.bf16 %v1841_v1  ;;  %v592_v17 = vunpack.c.l.bf16 %v1843_v46 }
  0xa5   :  { %v199_v42 = vpop.f32.mrf.mxu2  ;;  %v219_v61 = vpop.f32.mrf.mxu3 }
  0xa6   :  { %v200_v30 = vadd.f32 %v199_v42, %v132_v27  ;;  %v220_v55 = vadd.f32 %v219_v61, %v133_v35  ;;  %781 = vmatpush.msrb.mxu0 %v412_v36  ;;  %801 = vmatpush.msrb.mxu1 %v476_v31  ;;  %v1857_v27 = vld [vmem:[#allocation4 + $0x68] sm:$0xff]  ;;  %v384_v36 = vunpack.c.l.bf16 %v1845_v47  ;;  %v448_v31 = vunpack.c.l.bf16 %v1847_v52 }
  0xa7   :  { %v1859_v35 = vld [vmem:[#allocation4 + $0x168] sm:$0xff]  ;;  %v524_v42 = vunpack.c.l.bf16 %v1851_v12  ;;  %v588_v61 = vunpack.c.l.bf16 %v1853_v9 }
  0xa8   :  { %v1797_v63 = vmax.f32 %v200_v30, 0.0  ;;  %v1799_v0 = vmax.f32 %v220_v55, 0.0  ;;  %782 = vmatpush.msrb.mxu0 %v408_v32  ;;  %802 = vmatpush.msrb.mxu1 %v472_v43  ;;  %v1863_v32 = vld [vmem:[#allocation4 + $0x298] sm:$0xff] }
  0xa9   :  { %v1865_v43 = vld [vmem:[#allocation4 + $0x398] sm:$0xff] }
  0xaa   :  { %676 = vmatmul.f32.vlgmr.msrb.gmra.mxu2 %v1797_v63  ;;  %696 = vmatmul.f32.vlgmr.msrb.gmra.mxu3 %v1799_v0  ;;  %v1871_v30 = vld [vmem:[#allocation4 + $0x58] sm:$0xff] }
  0xab   :  { %783 = vmatpush.msrb.mxu0 %v404_v45  ;;  %803 = vmatpush.msrb.mxu1 %v468_v16  ;;  %v1873_v55 = vld [vmem:[#allocation4 + $0x158] sm:$0xff]  ;;  %v380_v45 = vunpack.c.l.bf16 %v1857_v27  ;;  %v444_v16 = vunpack.c.l.bf16 %v1859_v35 }
  0xac   :  { %820 = vmatpush.msrb.mxu2 %v544_v7  ;;  %840 = vmatpush.msrb.mxu3 %v608_v8  ;;  %v1877_v7 = vld [vmem:[#allocation4 + $0x288] sm:$0xff] }
  0xad   :  { %716 = vmatmul.f32.vlgmr.msra.gmra.mxu0 %v1767_v18  ;;  %804 = vmatpush.msrb.mxu1 %v464_v21  ;;  %v1879_v8 = vld [vmem:[#allocation4 + $0x388] sm:$0xff]  ;;  %v520_v21 = vunpack.c.l.bf16 %v1863_v32 }
  0xae   :  { %784 = vmatpush.msrb.mxu0 %v400_v40  ;;  %821 = vmatpush.msrb.mxu2 %v540_v37  ;;  %v584_v40 = vunpack.c.l.bf16 %v1865_v43  ;;  %v1883_v37 = vld [vmem:[#allocation4 + $0x48] sm:$0xff] }
  0xaf   :  { %841 = vmatpush.msrb.mxu3 %v604_v49  ;;  %736 = vmatmul.f32.vlgmr.msra.gmra.mxu1 %v1769_v25  ;;  %2127 = vst [vmem:[#allocation11_spill] sm:$0xff] %v1883_v37  ;;  %v1885_v49 = vld [vmem:[#allocation4 + $0x148] sm:$0xff] }
  0xb0   :  { %785 = vmatpush.msrb.mxu0 %v396_v53  ;;  %805 = vmatpush.msrb.mxu1 %v460_v54  ;;  %2128 = vst [vmem:[#allocation12_spill] sm:$0xff] %v1885_v49  ;;  %v376_v53 = vunpack.c.l.bf16 %v1871_v30  ;;  %v440_v54 = vunpack.c.l.bf16 %v1873_v55 }
  0xb1   :  { %822 = vmatpush.msrb.mxu2 %v536_v59  ;;  %842 = vmatpush.msrb.mxu3 %v600_v60  ;;  %v1889_v59 = vld [vmem:[#allocation4 + $0x278] sm:$0xff] }
  0xb2   :  { %786 = vmatpush.msrb.mxu0 %v392_v57  ;;  %806 = vmatpush.msrb.mxu1 %v456_v58  ;;  %2129 = vst [vmem:[#allocation9_spill] sm:$0xff] %v1889_v59  ;;  %v1891_v60 = vld [vmem:[#allocation4 + $0x378] sm:$0xff]  ;;  %v516_v57 = vunpack.c.l.bf16 %v1877_v7  ;;  %v580_v58 = vunpack.c.l.bf16 %v1879_v8 }
  0xb3   :  { %823 = vmatpush.msrb.mxu2 %v532_v33  ;;  %843 = vmatpush.msrb.mxu3 %v596_v34  ;;  %2130 = vst [vmem:[#allocation10_spill] sm:$0xff] %v1891_v60  ;;  %v1895_v33 = vld [vmem:[#allocation4 + $0x38] sm:$0xff] }
  0xb4   :  { %756 = vmatmul.f32.vlgmr.msra.gmra.mxu2 %v1797_v63  ;;  %776 = vmatmul.f32.vlgmr.msra.gmra.mxu3 %v1799_v0  ;;  %2131 = vst [vmem:[#allocation15_spill] sm:$0xff] %v1895_v33  ;;  %v1897_v34 = vld [vmem:[#allocation4 + $0x138] sm:$0xff] }
  0xb5   :  { %787 = vmatpush.msrb.mxu0 %v388_v24  ;;  %807 = vmatpush.msrb.mxu1 %v452_v15  ;;  %2132 = vst [vmem:[#allocation16_spill] sm:$0xff] %v1897_v34  ;;  %v372_v24 = vunpack.c.l.bf16 %v1883_v37  ;;  %v436_v15 = vunpack.c.l.bf16 %v1885_v49  ;;  %v1913_v49 = vld [vmem:[#allocation4 + $0x258] sm:$0xff] }
  0xb6   :  { %824 = vmatpush.msrb.mxu2 %v528_v20  ;;  %844 = vmatpush.msrb.mxu3 %v592_v17  ;;  %v1901_v20 = vld [vmem:[#allocation4 + $0x268] sm:$0xff]  ;;  %v1915_v37 = vld [vmem:[#allocation4 + $0x358] sm:$0xff] }
  0xb7   :  { %788 = vmatpush.msrb.mxu0 %v384_v36  ;;  %808 = vmatpush.msrb.mxu1 %v448_v31  ;;  %2133 = vst [vmem:[#allocation13_spill] sm:$0xff] %v1901_v20  ;;  %v1903_v17 = vld [vmem:[#allocation4 + $0x368] sm:$0xff]  ;;  %v512_v36 = vunpack.c.l.bf16 %v1889_v59  ;;  %v576_v31 = vunpack.c.l.bf16 %v1891_v60  ;;  %v1919_v60 = vld [vmem:[#allocation4 + $0x18] sm:$0xff] }
  0xb8   :  { %825 = vmatpush.msrb.mxu2 %v524_v42  ;;  %845 = vmatpush.msrb.mxu3 %v588_v61  ;;  %2134 = vst [vmem:[#allocation14_spill] sm:$0xff] %v1903_v17  ;;  %v1907_v42 = vld [vmem:[#allocation4 + $0x28] sm:$0xff]  ;;  %v1921_v59 = vld [vmem:[#allocation4 + $0x118] sm:$0xff] }
  0xb9   :  { %789 = vmatpush.msrb.mxu0 %v380_v45  ;;  %809 = vmatpush.msrb.mxu1 %v444_v16  ;;  %2135 = vst [vmem:[#allocation19_spill] sm:$0xff] %v1907_v42  ;;  %v1909_v61 = vld [vmem:[#allocation4 + $0x128] sm:$0xff]  ;;  %v368_v45 = vunpack.c.l.bf16 %v1895_v33  ;;  %v432_v16 = vunpack.c.l.bf16 %v1897_v34 }
  0xba   :  { %826 = vmatpush.msrb.mxu2 %v520_v21  ;;  %846 = vmatpush.msrb.mxu3 %v584_v40  ;;  %2136 = vst [vmem:[#allocation20_spill] sm:$0xff] %v1909_v61  ;;  %v508_v21 = vunpack.c.l.bf16 %v1901_v20  ;;  %v572_v40 = vunpack.c.l.bf16 %v1903_v17  ;;  %v1925_v34 = vld [vmem:[#allocation4 + $0x248] sm:$0xff] }
  0xbb   :  { %790 = vmatpush.msrb.mxu0 %v376_v53  ;;  %810 = vmatpush.msrb.mxu1 %v440_v54  ;;  %2137 = vst [vmem:[#allocation17_spill] sm:$0xff] %v1915_v37  ;;  %v364_v53 = vunpack.c.l.bf16 %v1907_v42  ;;  %v428_v54 = vunpack.c.l.bf16 %v1909_v61  ;;  %v1927_v33 = vld [vmem:[#allocation4 + $0x348] sm:$0xff]  ;;  %v1937_v61 = vld [vmem:[#allocation4 + $0x238] sm:$0xff] }
  0xbc   :  { %827 = vmatpush.msrb.mxu2 %v516_v57  ;;  %847 = vmatpush.msrb.mxu3 %v580_v58  ;;  %2138 = vst [vmem:[#allocation18_spill] sm:$0xff] %v1919_v60  ;;  %v504_v57 = vunpack.c.l.bf16 %v1913_v49  ;;  %v568_v58 = vunpack.c.l.bf16 %v1915_v37  ;;  %v1931_v17 = vld [vmem:[#allocation4 + $0x8] sm:$0xff]  ;;  %v1939_v42 = vld [vmem:[#allocation4 + $0x338] sm:$0xff] }
  0xbd   :  { %2139 = vst [vmem:[#allocation21_spill] sm:$0xff] %v1921_v59  ;;  %791 = vmatpush.msrb.mxu0 %v372_v24  ;;  %811 = vmatpush.msrb.mxu1 %v436_v15  ;;  %v1933_v20 = vld [vmem:[#allocation4 + $0x108] sm:$0xff]  ;;  %v360_v24 = vunpack.c.l.bf16 %v1919_v60  ;;  %v424_v15 = vunpack.c.l.bf16 %v1921_v59  ;;  %v356_v37 = vunpack.c.l.bf16 %v1931_v17  ;;  %v560_v59 = vunpack.c.l.bf16 %v1939_v42 }
  0xbe   :  { %828 = vmatpush.msrb.mxu2 %v512_v36  ;;  %848 = vmatpush.msrb.mxu3 %v576_v31  ;;  %2140 = vst [vmem:[#allocation22_spill] sm:$0xff] %v1939_v42  ;;  %v500_v36 = vunpack.c.l.bf16 %v1925_v34  ;;  %v564_v31 = vunpack.c.l.bf16 %v1927_v33  ;;  %v1947_v60 = vld [vmem:[#allocation4 + $0x228] sm:$0xff] }
  0xbf   :  { %792 = vmatpush.msrb.mxu0 %v368_v45  ;;  %812 = vmatpush.msrb.mxu1 %v432_v16  ;;  %v420_v45 = vunpack.c.l.bf16 %v1933_v20  ;;  %v496_v16 = vunpack.c.l.bf16 %v1937_v61 }
  0xc0   :  { %829 = vmatpush.msrb.mxu2 %v508_v21  ;;  %849 = vmatpush.msrb.mxu3 %v572_v40  ;;  %v1949_v21 = vld [vmem:[#allocation4 + $0x328] sm:$0xff]  ;;  %v417_v40 = vunpack.c.h.bf16 %v1757_v2 }
  0xc1   :  { %793 = vmatpush.msrb.mxu0 %v364_v53  ;;  %813 = vmatpush.msrb.mxu1 %v428_v54  ;;  %v481_v53 = vunpack.c.h.bf16 %v1759_v11  ;;  %v1953_v54 = vld [vmem:[#allocation4 + $0x218] sm:$0xff]  ;;  %v556_v42 = vunpack.c.l.bf16 %v1949_v21  ;;  %v1963_v2 = vld [vmem:[#allocation4 + $0x308] sm:$0xff] }
  0xc2   :  { %830 = vmatpush.msrb.mxu2 %v504_v57  ;;  %850 = vmatpush.msrb.mxu3 %v568_v58  ;;  %v1955_v57 = vld [vmem:[#allocation4 + $0x318] sm:$0xff]  ;;  %v492_v58 = vunpack.c.l.bf16 %v1947_v60  ;;  %v488_v11 = vunpack.c.l.bf16 %v1953_v54 }
  0xc3   :  { %794 = vmatpush.msrb.mxu0 %v360_v24  ;;  %814 = vmatpush.msrb.mxu1 %v424_v15  ;;  %v413_v24 = vunpack.c.h.bf16 %v1761_v10  ;;  %v477_v15 = vunpack.c.h.bf16 %v1763_v19  ;;  %v473_v10 = vunpack.c.h.bf16 %v1773_v26  ;;  %v609_v26 = vunpack.c.h.bf16 %v1787_v29 }
  0xc4   :  { %831 = vmatpush.msrb.mxu2 %v500_v36  ;;  %851 = vmatpush.msrb.mxu3 %v564_v31  ;;  %v1961_v36 = vld [vmem:[#allocation4 + $0x208] sm:$0xff]  ;;  %v548_v31 = vunpack.c.l.bf16 %v1963_v2  ;;  %v461_v29 = vunpack.c.h.bf16 %v1808_v39  ;;  %v389_v39 = vunpack.c.h.bf16 %v1834_v3  ;;  %v589_v3 = vunpack.c.h.bf16 %v1853_v9 }
  0xc5   :  { %795 = vmatpush.msrb.mxu0 %v356_v37  ;;  %815 = vmatpush.msrb.mxu1 %v420_v45  ;;  %v552_v37 = vunpack.c.l.bf16 %v1955_v57  ;;  %v484_v19 = vunpack.c.l.bf16 %v1961_v36  ;;  %v405_v45 = vunpack.c.h.bf16 %v1781_v44  ;;  %v541_v44 = vunpack.c.h.bf16 %v1795_v14 }
  0xc6   :  { %832 = vmatpush.msrb.mxu2 %v496_v16  ;;  %852 = vmatpush.msrb.mxu3 %v560_v59  ;;  %v409_v59 = vunpack.c.h.bf16 %v1771_v28  ;;  %v469_v16 = vunpack.c.h.bf16 %v1783_v41  ;;  %v545_v28 = vunpack.c.h.bf16 %v1785_v62  ;;  %v605_v41 = vunpack.c.h.bf16 %v1803_v23 }
  0xc7   :  { %796 = vmatmul.f32.vlgmr.msrb.gmra.mxu0 %v1767_v18  ;;  %816 = vmatmul.f32.vlgmr.msrb.gmra.mxu1 %v1769_v25  ;;  %v397_v62 = vunpack.c.h.bf16 %v1806_v22  ;;  %v457_v14 = vunpack.c.h.bf16 %v1821_v6  ;;  %v533_v23 = vunpack.c.h.bf16 %v1825_v50  ;;  %v597_v22 = vunpack.c.h.bf16 %v1827_v51 }
  0xc8   :  { %860 = vmatpush.msra.mxu0 %v417_v40  ;;  %880 = vmatpush.msra.mxu1 %v481_v53  ;;  %v465_v40 = vunpack.c.h.bf16 %v1789_v56  ;;  %v601_v56 = vunpack.c.h.bf16 %v1816_v48  ;;  %v393_v53 = vunpack.c.h.bf16 %v1819_v5  ;;  %v529_v48 = vunpack.c.h.bf16 %v1841_v1 }
  0xc9   :  { %833 = vmatpush.msrb.mxu2 %v492_v58  ;;  %853 = vmatpush.msrb.mxu3 %v556_v42  ;;  %v401_v42 = vunpack.c.h.bf16 %v1793_v13  ;;  %v537_v13 = vunpack.c.h.bf16 %v1814_v38  ;;  %v453_v38 = vunpack.c.h.bf16 %v1836_v4  ;;  %v593_v5 = vunpack.c.h.bf16 %v1843_v46 }
  0xca   :  { %861 = vmatpush.msra.mxu0 %v413_v24  ;;  %881 = vmatpush.msra.mxu1 %v477_v15  ;;  %v385_v6 = vunpack.c.h.bf16 %v1845_v47  ;;  %v449_v50 = vunpack.c.h.bf16 %v1847_v52  ;;  %v525_v51 = vunpack.c.h.bf16 %v1851_v12  ;;  %v381_v4 = vunpack.c.h.bf16 %v1857_v27  ;;  %v2142_v24 = vld [vmem:[#allocation12_spill] sm:$0xff] }
  0xcb   :  { %834 = vmatpush.msrb.mxu2 %v488_v11  ;;  %854 = vmatpush.msrb.mxu3 %v552_v37  ;;  %v445_v1 = vunpack.c.h.bf16 %v1859_v35  ;;  %v521_v46 = vunpack.c.h.bf16 %v1863_v32  ;;  %v585_v47 = vunpack.c.h.bf16 %v1865_v43  ;;  %v377_v52 = vunpack.c.h.bf16 %v1871_v30  ;;  %v2141_v35 = vld [vmem:[#allocation11_spill] sm:$0xff]  ;;  %v2143_v43 = vld [vmem:[#allocation9_spill] sm:$0xff]  ;;  %v2144_v11 = vld [vmem:[#allocation10_spill] sm:$0xff] }
  0xcc   :  { %862 = vmatpush.msra.mxu0 %v409_v59  ;;  %882 = vmatpush.msra.mxu1 %v473_v10  ;;  %v441_v12 = vunpack.c.h.bf16 %v1873_v55  ;;  %v517_v9 = vunpack.c.h.bf16 %v1877_v7  ;;  %v581_v27 = vunpack.c.h.bf16 %v1879_v8  ;;  %v373_v58 = vunpack.c.h.bf16 %v2141_v35  ;;  %v2145_v55 = vld [vmem:[#allocation15_spill] sm:$0xff]  ;;  %v2146_v59 = vld [vmem:[#allocation16_spill] sm:$0xff]  ;;  %v2147_v8 = vld [vmem:[#allocation13_spill] sm:$0xff] }
  0xcd   :  { %835 = vmatpush.msrb.mxu2 %v484_v19  ;;  %855 = vmatpush.msrb.mxu3 %v548_v31  ;;  %v437_v32 = vunpack.c.h.bf16 %v2142_v24  ;;  %v513_v15 = vunpack.c.h.bf16 %v2143_v43  ;;  %v577_v30 = vunpack.c.h.bf16 %v2144_v11  ;;  %v369_v37 = vunpack.c.h.bf16 %v2145_v55  ;;  %v2148_v19 = vld [vmem:[#allocation14_spill] sm:$0xff]  ;;  %v1309_v35 = vld [vmem:[#allocation6 + $0x10] sm:$0xff]  }
  0xce   :  { %836 = vmatmul.f32.vlgmr.msrb.gmra.mxu2 %v1797_v63  ;;  %856 = vmatmul.f32.vlgmr.msrb.gmra.mxu3 %v1799_v0  ;;  %v433_v7 = vunpack.c.h.bf16 %v2146_v59  ;;  %v509_v10 = vunpack.c.h.bf16 %v2147_v8  ;;  %v573_v31 = vunpack.c.h.bf16 %v2148_v19  ;;  %v1191_v24 = vunpack.c.h.bf16 %v1309_v35  ;;  %v1308_v11 = vld [vmem:[#allocation6 + $0x8] sm:$0xff]   ;;  %v1181_v8 = vld [vmem:[#allocation6] sm:$0xff]  }
  0xcf   :  { %863 = vmatpush.msra.mxu0 %v405_v45  ;;  %883 = vmatpush.msra.mxu1 %v469_v16  ;;  %v2149_v45 = vld [vmem:[#allocation19_spill] sm:$0xff]  ;;  %v1190_v43 = vunpack.c.l.bf16 %v1309_v35  ;;  %v1187_v55 = vunpack.c.h.bf16 %v1308_v11  ;;  %v1186_v59 = vunpack.c.l.bf16 %v1308_v11  ;;  %v1183_v19 = vunpack.c.h.bf16 %v1181_v8 }
  0xd0   :  { %900 = vmatpush.msra.mxu2 %v545_v28  ;;  %920 = vmatpush.msra.mxu3 %v609_v26  ;;  %v365_v16 = vunpack.c.h.bf16 %v2149_v45  ;;  %v2150_v28 = vld [vmem:[#allocation20_spill] sm:$0xff] }
  0xd1   :  { %864 = vmatpush.msra.mxu0 %v401_v42  ;;  %884 = vmatpush.msra.mxu1 %v465_v40  ;;  %v429_v26 = vunpack.c.h.bf16 %v2150_v28  ;;  %v505_v42 = vunpack.c.h.bf16 %v1913_v49  ;;  %v2151_v40 = vld [vmem:[#allocation17_spill] sm:$0xff]  ;;  %v421_v49 = vunpack.c.h.bf16 %v1933_v20  ;;  %v1330_v45 = vld [vmem:[#allocation6 + $0xb8] sm:$0xff]   ;;  %v1182_v28 = vunpack.c.l.bf16 %v1181_v8 }
  0xd2   :  { %901 = vmatpush.msra.mxu2 %v541_v44  ;;  %921 = vmatpush.msra.mxu3 %v605_v41  ;;  %v569_v44 = vunpack.c.h.bf16 %v2151_v40  ;;  %v2152_v41 = vld [vmem:[#allocation18_spill] sm:$0xff] }
  0xd3   :  { %865 = vmatpush.msra.mxu0 %v397_v62  ;;  %885 = vmatpush.msra.mxu1 %v461_v29  ;;  %v361_v62 = vunpack.c.h.bf16 %v2152_v41  ;;  %v2153_v29 = vld [vmem:[#allocation21_spill] sm:$0xff] }
  0xd4   :  { %902 = vmatpush.msra.mxu2 %v537_v13  ;;  %922 = vmatpush.msra.mxu3 %v601_v56  ;;  %v425_v13 = vunpack.c.h.bf16 %v2153_v29  ;;  %v501_v56 = vunpack.c.h.bf16 %v1925_v34  ;;  %v557_v34 = vunpack.c.h.bf16 %v1949_v21  ;;  %v549_v21 = vunpack.c.h.bf16 %v1963_v2  ;;  %v1311_v2 = vld [vmem:[#allocation6 + $0x20] sm:$0xff]  }
  0xd5   :  { %866 = vmatpush.msra.mxu0 %v393_v53  ;;  %886 = vmatpush.msra.mxu1 %v457_v14  ;;  %v565_v53 = vunpack.c.h.bf16 %v1927_v33  ;;  %v357_v14 = vunpack.c.h.bf16 %v1931_v17  ;;  %v493_v33 = vunpack.c.h.bf16 %v1947_v60  ;;  %v485_v60 = vunpack.c.h.bf16 %v1961_v36  ;;  %v1315_v29 = vld [vmem:[#allocation6 + $0x40] sm:$0xff]  }
  0xd6   :  { %903 = vmatpush.msra.mxu2 %v533_v23  ;;  %923 = vmatpush.msra.mxu3 %v597_v22  ;;  %v497_v23 = vunpack.c.h.bf16 %v1937_v61  ;;  %v2154_v22 = vld [vmem:[#allocation22_spill] sm:$0xff]  ;;  %v489_v61 = vunpack.c.h.bf16 %v1953_v54 }
  0xd7   :  { %867 = vmatpush.msra.mxu0 %v389_v39  ;;  %887 = vmatpush.msra.mxu1 %v453_v38  ;;  %v561_v39 = vunpack.c.h.bf16 %v2154_v22  ;;  %v1314_v38 = vld [vmem:[#allocation6 + $0x38] sm:$0xff]  }
  0xd8   :  { %904 = vmatpush.msra.mxu2 %v529_v48  ;;  %924 = vmatpush.msra.mxu3 %v593_v5  ;;  %v1322_v48 = vld [vmem:[#allocation6 + $0x78] sm:$0xff]   ;;  %v1211_v17 = vunpack.c.h.bf16 %v1314_v38  ;;  %v553_v5 = vunpack.c.h.bf16 %v1955_v57  ;;  %v1312_v57 = vld [vmem:[#allocation6 + $0x28] sm:$0xff]  }
  0xd9   :  { %868 = vmatpush.msra.mxu0 %v385_v6  ;;  %888 = vmatpush.msra.mxu1 %v449_v50  ;;  %v1243_v20 = vunpack.c.h.bf16 %v1322_v48  ;;  %v1210_v6 = vunpack.c.l.bf16 %v1314_v38  ;;  %v1313_v50 = vld [vmem:[#allocation6 + $0x30] sm:$0xff]   ;;  %v1202_v36 = vunpack.c.l.bf16 %v1312_v57 }
  0xda   :  { %905 = vmatpush.msra.mxu2 %v525_v51  ;;  %925 = vmatpush.msra.mxu3 %v589_v3  ;;  %v1242_v51 = vunpack.c.l.bf16 %v1322_v48  ;;  %v1207_v54 = vunpack.c.h.bf16 %v1313_v50  ;;  %v1321_v3 = vld [vmem:[#allocation6 + $0x70] sm:$0xff]   ;;  %v1327_v48 = vld [vmem:[#allocation6 + $0xa0] sm:$0xff]  }
  0xdb   :  { %869 = vmatpush.msra.mxu0 %v381_v4  ;;  %889 = vmatpush.msra.mxu1 %v445_v1  ;;  %v1199_v4 = vunpack.c.h.bf16 %v1311_v2  ;;  %v1239_v1 = vunpack.c.h.bf16 %v1321_v3 }
  0xdc   :  { %906 = vmatpush.msra.mxu2 %v521_v46  ;;  %926 = vmatpush.msra.mxu3 %v585_v47  ;;  %v1198_v46 = vunpack.c.l.bf16 %v1311_v2  ;;  %v1238_v47 = vunpack.c.l.bf16 %v1321_v3 }
  0xdd   :  { %870 = vmatpush.msra.mxu0 %v377_v52  ;;  %890 = vmatpush.msra.mxu1 %v441_v12  ;;  %v1310_v52 = vld [vmem:[#allocation6 + $0x18] sm:$0xff]   ;;  %v1320_v12 = vld [vmem:[#allocation6 + $0x68] sm:$0xff]  }
  0xde   :  { %907 = vmatpush.msra.mxu2 %v517_v9  ;;  %927 = vmatpush.msra.mxu3 %v581_v27  ;;  %v1195_v9 = vunpack.c.h.bf16 %v1310_v52  ;;  %v1234_v27 = vunpack.c.l.bf16 %v1320_v12 }
  0xdf   :  { %871 = vmatpush.msra.mxu0 %v373_v58  ;;  %891 = vmatpush.msra.mxu1 %v437_v32  ;;  %v1319_v58 = vld [vmem:[#allocation6 + $0x60] sm:$0xff]  }
  0xe0   :  { %908 = vmatpush.msra.mxu2 %v513_v15  ;;  %928 = vmatpush.msra.mxu3 %v577_v30  ;;  %v1231_v32 = vunpack.c.h.bf16 %v1319_v58  ;;  %v1230_v15 = vunpack.c.l.bf16 %v1319_v58  ;;  %v1318_v30 = vld [vmem:[#allocation6 + $0x58] sm:$0xff]  }
  0xe1   :  { %872 = vmatpush.msra.mxu0 %v369_v37  ;;  %892 = vmatpush.msra.mxu1 %v433_v7  ;;  %v1227_v37 = vunpack.c.h.bf16 %v1318_v30  ;;  %v1226_v7 = vunpack.c.l.bf16 %v1318_v30  ;;  %v1338_v58 = vld [vmem:[#allocation6 + $0xf8] sm:$0xff]  }
  0xe2   :  { %909 = vmatpush.msra.mxu2 %v509_v10  ;;  %929 = vmatpush.msra.mxu3 %v573_v31  ;;  %v1317_v10 = vld [vmem:[#allocation6 + $0x50] sm:$0xff]  }
  0xe3   :  { %873 = vmatpush.msra.mxu0 %v365_v16  ;;  %893 = vmatpush.msra.mxu1 %v429_v26  ;;  %v1223_v31 = vunpack.c.h.bf16 %v1317_v10  ;;  %v1275_v16 = vunpack.c.h.bf16 %v1330_v45  ;;  %v1222_v26 = vunpack.c.l.bf16 %v1317_v10 }
  0xe4   :  { %910 = vmatpush.msra.mxu2 %v505_v42  ;;  %930 = vmatpush.msra.mxu3 %v569_v44  ;;  %v1316_v42 = vld [vmem:[#allocation6 + $0x48] sm:$0xff]   ;;  %v1274_v44 = vunpack.c.l.bf16 %v1330_v45 }
  0xe5   :  { %874 = vmatpush.msra.mxu0 %v361_v62  ;;  %894 = vmatpush.msra.mxu1 %v425_v13  ;;  %v1219_v40 = vunpack.c.h.bf16 %v1316_v42  ;;  %v1218_v41 = vunpack.c.l.bf16 %v1316_v42  ;;  %v1329_v62 = vld [vmem:[#allocation6 + $0xb0] sm:$0xff]  }
  0xe6   :  { %911 = vmatpush.msra.mxu2 %v501_v56  ;;  %931 = vmatpush.msra.mxu3 %v565_v53  ;;  %v1271_v13 = vunpack.c.h.bf16 %v1329_v62  ;;  %v1215_v56 = vunpack.c.h.bf16 %v1315_v29  ;;  %v1270_v53 = vunpack.c.l.bf16 %v1329_v62 }
  0xe7   :  { %875 = vmatpush.msra.mxu0 %v357_v14  ;;  %895 = vmatpush.msra.mxu1 %v421_v49  ;;  %v1214_v14 = vunpack.c.l.bf16 %v1315_v29  ;;  %v1328_v49 = vld [vmem:[#allocation6 + $0xa8] sm:$0xff]  }
  0xe8   :  { %912 = vmatpush.msra.mxu2 %v497_v23  ;;  %932 = vmatpush.msra.mxu3 %v561_v39  ;;  %v2040_v23 = vld [vmem:[%s2062_s4] sm:$0xf]  ;;  %v1267_v22 = vunpack.c.h.bf16 %v1328_v49  ;;  %v1266_v39 = vunpack.c.l.bf16 %v1328_v49 }
  0xe9   :  { %876 = vmatmul.f32.vlgmr.msra.gmra.mxu0 %v1767_v18  ;;  %896 = vmatmul.f32.vlgmr.msra.gmra.mxu1 %v1769_v25  ;;  %v1206_v18 = vunpack.c.l.bf16 %v1313_v50  ;;  %v1203_v25 = vunpack.c.h.bf16 %v1312_v57  ;;  %v612_v38 = vperm.slane %v2040_v23, 0 }
  0xea   :  { %913 = vmatpush.msra.mxu2 %v493_v33  ;;  %933 = vmatpush.msra.mxu3 %v557_v34  ;;  %v1263_v34 = vunpack.c.h.bf16 %v1327_v48 }
  0xeb   :  { %1076 = vmatpush.msrb.mxu0 %v1211_v17  ;;  %1096 = vmatpush.msrb.mxu1 %v1243_v20  ;;  %v1262_v20 = vunpack.c.l.bf16 %v1327_v48  ;;  %v1331_v48 = vld [vmem:[#allocation6 + $0xc0] sm:$0xff]  }
  0xec   :  { %914 = vmatpush.msra.mxu2 %v489_v61  ;;  %934 = vmatpush.msra.mxu3 %v553_v5  ;;  %v1326_v61 = vld [vmem:[#allocation6 + $0x98] sm:$0xff]  }
  0xed   :  { %1077 = vmatpush.msrb.mxu0 %v1210_v6  ;;  %1097 = vmatpush.msrb.mxu1 %v1242_v51  ;;  %v1259_v5 = vunpack.c.h.bf16 %v1326_v61  ;;  %v1325_v6 = vld [vmem:[#allocation6 + $0x90] sm:$0xff]   ;;  %v1258_v51 = vunpack.c.l.bf16 %v1326_v61  ;;  %v615_v61 = vperm.slane %v2040_v23, 3 }
  0xee   :  { %915 = vmatpush.msra.mxu2 %v485_v60  ;;  %935 = vmatpush.msra.mxu3 %v549_v21  ;;  %v1255_v21 = vunpack.c.h.bf16 %v1325_v6  ;;  %v1254_v57 = vunpack.c.l.bf16 %v1325_v6 }
  0xef   :  { %916 = vmatmul.f32.vlgmr.msra.gmra.mxu2 %v1797_v63  ;;  %936 = vmatmul.f32.vlgmr.msra.gmra.mxu3 %v1799_v0  ;;  %v1235_v63 = vunpack.c.h.bf16 %v1320_v12  ;;  %v1194_v0 = vunpack.c.l.bf16 %v1310_v52 }
  0xf0   :  { %1078 = vmatpush.msrb.mxu0 %v1207_v54  ;;  %1098 = vmatpush.msrb.mxu1 %v1239_v1 }
  0xf1   :  { %1116 = vmatpush.msrb.mxu2 %v1275_v16  ;;  %v1334_v16 = vld [vmem:[#allocation6 + $0xd8] sm:$0xff]  }
  0xf2   :  { %1079 = vmatpush.msrb.mxu0 %v1206_v18  ;;  %1099 = vmatpush.msrb.mxu1 %v1238_v47  ;;  %v613_v18 = vperm.slane %v2040_v23, 1 }
  0xf3   :  { %1117 = vmatpush.msrb.mxu2 %v1274_v44  ;;  %v1333_v44 = vld [vmem:[#allocation6 + $0xd0] sm:$0xff]  }
  0xf4   :  { %1080 = vmatpush.msrb.mxu0 %v1203_v25  ;;  %1100 = vmatpush.msrb.mxu1 %v1235_v63  ;;  %v1286_v29 = vunpack.c.l.bf16 %v1333_v44 }
  0xf5   :  { %1118 = vmatpush.msrb.mxu2 %v1271_v13 }
  0xf6   :  { %1081 = vmatpush.msrb.mxu0 %v1202_v36  ;;  %1101 = vmatpush.msrb.mxu1 %v1234_v27 }
  0xf7   :  { %1119 = vmatpush.msrb.mxu2 %v1270_v53 }
  0xf8   :  { %1082 = vmatpush.msrb.mxu0 %v1199_v4  ;;  %1102 = vmatpush.msrb.mxu1 %v1231_v32  ;;  %v1324_v4 = vld [vmem:[#allocation6 + $0x88] sm:$0xff]   ;;  %v1307_v32 = vunpack.c.h.bf16 %v1338_v58 }
  0xf9   :  { %1120 = vmatpush.msrb.mxu2 %v1267_v22  ;;  %v1251_v1 = vunpack.c.h.bf16 %v1324_v4  ;;  %v1250_v12 = vunpack.c.l.bf16 %v1324_v4 }
  0xfa   :  { %1083 = vmatpush.msrb.mxu0 %v1198_v46  ;;  %1103 = vmatpush.msrb.mxu1 %v1230_v15  ;;  %v1337_v15 = vld [vmem:[#allocation6 + $0xf0] sm:$0xff]  }
  0xfb   :  { %1121 = vmatpush.msrb.mxu2 %v1266_v39  ;;  %1136 = vmatpush.msrb.mxu3 %v1307_v32 }
  0xfc   :  { %1084 = vmatpush.msrb.mxu0 %v1195_v9  ;;  %1104 = vmatpush.msrb.mxu1 %v1227_v37  ;;  %v1323_v9 = vld [vmem:[#allocation6 + $0x80] sm:$0xff]   ;;  %v1336_v37 = vld [vmem:[#allocation6 + $0xe8] sm:$0xff]  }
  0xfd   :  { %1122 = vmatpush.msrb.mxu2 %v1263_v34  ;;  %v1247_v63 = vunpack.c.h.bf16 %v1323_v9  ;;  %v1246_v27 = vunpack.c.l.bf16 %v1323_v9  ;;  %v1299_v8 = vunpack.c.h.bf16 %v1336_v37  ;;  %v1298_v10 = vunpack.c.l.bf16 %v1336_v37 }
  0xfe   :  { %1085 = vmatpush.msrb.mxu0 %v1194_v0  ;;  %1105 = vmatpush.msrb.mxu1 %v1226_v7  ;;  %v1302_v7 = vunpack.c.l.bf16 %v1337_v15  ;;  %v1279_v34 = vunpack.c.h.bf16 %v1331_v48 }
  0xff   :  { %1123 = vmatpush.msrb.mxu2 %v1262_v20  ;;  %v1278_v20 = vunpack.c.l.bf16 %v1331_v48 }
 0x100   :  { %1086 = vmatpush.msrb.mxu0 %v1191_v24  ;;  %1106 = vmatpush.msrb.mxu1 %v1223_v31 }
 0x101   :  { %1124 = vmatpush.msrb.mxu2 %v1259_v5 }
 0x102   :  { %1087 = vmatpush.msrb.mxu0 %v1190_v43  ;;  %1107 = vmatpush.msrb.mxu1 %v1222_v26  ;;  %v1306_v43 = vunpack.c.l.bf16 %v1338_v58  ;;  %v1291_v26 = vunpack.c.h.bf16 %v1334_v16 }
 0x103   :  { %1125 = vmatpush.msrb.mxu2 %v1258_v51 }
 0x104   :  { %1088 = vmatpush.msrb.mxu0 %v1187_v55  ;;  %1108 = vmatpush.msrb.mxu1 %v1219_v40  ;;  %v1303_v55 = vunpack.c.h.bf16 %v1337_v15  ;;  %v1290_v40 = vunpack.c.l.bf16 %v1334_v16 }
 0x105   :  { %1126 = vmatpush.msrb.mxu2 %v1255_v21  ;;  %1137 = vmatpush.msrb.mxu3 %v1306_v43 }
 0x106   :  { %1089 = vmatpush.msrb.mxu0 %v1186_v59  ;;  %1109 = vmatpush.msrb.mxu1 %v1218_v41  ;;  %v1287_v41 = vunpack.c.h.bf16 %v1333_v44 }
 0x107   :  { %1127 = vmatpush.msrb.mxu2 %v1254_v57  ;;  %1138 = vmatpush.msrb.mxu3 %v1303_v55 }
 0x108   :  { %1090 = vmatpush.msrb.mxu0 %v1183_v19  ;;  %1110 = vmatpush.msrb.mxu1 %v1215_v56  ;;  %v1335_v19 = vld [vmem:[#allocation6 + $0xe0] sm:$0xff]   ;;  %v1332_v56 = vld [vmem:[#allocation6 + $0xc8] sm:$0xff]  }
 0x109   :  { %1128 = vmatpush.msrb.mxu2 %v1251_v1  ;;  %1139 = vmatpush.msrb.mxu3 %v1302_v7  ;;  %v1295_v31 = vunpack.c.h.bf16 %v1335_v19  ;;  %v1294_v45 = vunpack.c.l.bf16 %v1335_v19  ;;  %v1282_v39 = vunpack.c.l.bf16 %v1332_v56 }
 0x10a   :  { %1091 = vmatpush.msrb.mxu0 %v1182_v28  ;;  %1111 = vmatpush.msrb.mxu1 %v1214_v14  ;;  %v614_v28 = vperm.slane %v2040_v23, 2  ;;  %v1283_v14 = vunpack.c.h.bf16 %v1332_v56 }
 0x10b   :  { %1129 = vmatpush.msrb.mxu2 %v1250_v12  ;;  %1140 = vmatpush.msrb.mxu3 %v1299_v8 }
 0x10d   :  { %1130 = vmatpush.msrb.mxu2 %v1247_v63  ;;  %1141 = vmatpush.msrb.mxu3 %v1298_v10  ;;  %v1348_v63 = vld [vmem:[%s2066_s8] ss:$0 sm:$0xff] }
 0x10f   :  { %1131 = vmatpush.msrb.mxu2 %v1246_v27  ;;  %1142 = vmatpush.msrb.mxu3 %v1295_v31 }
 0x111   :  { %1143 = vmatpush.msrb.mxu3 %v1294_v45 }
 0x113   :  { %1144 = vmatpush.msrb.mxu3 %v1291_v26 }
 0x115   :  { %1145 = vmatpush.msrb.mxu3 %v1290_v40 }
 0x117   :  { %1146 = vmatpush.msrb.mxu3 %v1287_v41 }
 0x119   :  { %1147 = vmatpush.msrb.mxu3 %v1286_v29 }
 0x11b   :  { %1148 = vmatpush.msrb.mxu3 %v1283_v14 }
 0x11d   :  { %1149 = vmatpush.msrb.mxu3 %v1282_v39 }
 0x11f   :  { %1150 = vmatpush.msrb.mxu3 %v1279_v34 }
 0x120   :  { %v637_v33 = vpop.f32.mrf.mxu0  ;;  %v657_v50 = vpop.f32.mrf.mxu1 }
 0x121   :  { %v638_v17 = vadd.f32 %v637_v33, %v612_v38  ;;  %1151 = vmatpush.msrb.mxu3 %v1278_v20 }
 0x123   :  { %v658_v60 = vadd.f32 %v657_v50, %v638_v17 }
 0x12a   :  { %v717_v36 = vpop.f32.mrf.mxu0 }
 0x12b   :  { %v718_v46 = vadd.f32 %v717_v36, %v613_v18 }
 0x12c   :  { %v737_v52 = vpop.f32.mrf.mxu1 }
 0x12d   :  { %v677_v54 = vpop.f32.mrf.mxu2  ;;  %v697_v2 = vpop.f32.mrf.mxu3  ;;  %v738_v0 = vadd.f32 %v737_v52, %v718_v46  ;;  %v1347_v52 = vld [vmem:[%s2065_s7] ss:$0 sm:$0xff] }
 0x12e   :  { %v678_v25 = vadd.f32 %v677_v54, %v658_v60 }
 0x130   :  { %v698_v3 = vadd.f32 %v697_v2, %v678_v25  ;;  %v1346_v25 = vld [vmem:[%s2064_s6] ss:$0 sm:$0xff] }
 0x132   :  { %v940_v47 = vmax.f32 %v698_v3, 0.0 }
 0x134   :  { %1092 = vmatmul.f32.vlgmr.msrb.gmra.mxu0 %v940_v47 }
 0x137   :  { %v757_v35 = vpop.f32.mrf.mxu2  ;;  %v777_v11 = vpop.f32.mrf.mxu3 }
 0x138   :  { %v758_v24 = vadd.f32 %v757_v35, %v738_v0 }
 0x13a   :  { %v778_v30 = vadd.f32 %v777_v11, %v758_v24 }
 0x13c   :  { %v941_v59 = vmax.f32 %v778_v30, 0.0 }
 0x13e   :  { %1112 = vmatmul.f32.vlgmr.msrb.gmra.mxu1 %v941_v59 }
 0x144   :  { %v797_v42 = vpop.f32.mrf.mxu0  ;;  %v817_v13 = vpop.f32.mrf.mxu1 }
 0x145   :  { %v798_v62 = vadd.f32 %v797_v42, %v614_v28 }
 0x147   :  { %v818_v53 = vadd.f32 %v817_v13, %v798_v62 }
 0x151   :  { %v837_v49 = vpop.f32.mrf.mxu2  ;;  %v857_v38 = vpop.f32.mrf.mxu3 }
 0x152   :  { %v838_v22 = vadd.f32 %v837_v49, %v818_v53 }
 0x154   :  { %v858_v33 = vadd.f32 %v857_v38, %v838_v22 }
 0x156   :  { %v942_v17 = vmax.f32 %v858_v33, 0.0 }
 0x158   :  { %1132 = vmatmul.f32.vlgmr.msrb.gmra.mxu2 %v942_v17 }
 0x166   :  { %v877_v5 = vpop.f32.mrf.mxu0  ;;  %v897_v50 = vpop.f32.mrf.mxu1 }
 0x167   :  { %v878_v6 = vadd.f32 %v877_v5, %v615_v61 }
 0x169   :  { %v898_v51 = vadd.f32 %v897_v50, %v878_v6 }
 0x172   :  { %v917_v60 = vpop.f32.mrf.mxu2  ;;  %v937_v54 = vpop.f32.mrf.mxu3 }
 0x173   :  { %v918_v21 = vadd.f32 %v917_v60, %v898_v51 }
 0x175   :  { %v938_v57 = vadd.f32 %v937_v54, %v918_v21 }
 0x177   :  { %v943_v18 = vmax.f32 %v938_v57, 0.0 }
 0x179   :  { %1152 = vmatmul.f32.vlgmr.msrb.gmra.mxu3 %v943_v18 }
 0x1b1   :  { %v1093_v36 = vpop.f32.mrf.mxu0 }
 0x1b2   :  { %v1094_v3 = vadd.f32 %v1346_v25, %v1093_v36 }
 0x1bb   :  { %v1113_v2 = vpop.f32.mrf.mxu1 }
 0x1bc   :  { %v1114_v1 = vadd.f32 %v1113_v2, %v1094_v3 }
 0x1db   :  { %v1133_v4 = vpop.f32.mrf.mxu2 }
 0x1dc   :  { %v1134_v23 = vadd.f32 %v1133_v4, %v1114_v1 }
 0x1fc   :  { %v1153_v46 = vpop.f32.mrf.mxu3 }
 0x1fd   :  { %v1154_v47 = vadd.f32 %v1153_v46, %v1134_v23 }
 0x1ff   :  { %v1156_v12 = vmax.f32 %v1154_v47, 0.0 }
 0x201   :  { %v1161_v9 = vmul.f32 %v1347_v52, %v1156_v12 }
 0x203   :  { %1162 = vadd.xlane.f32.xlu0 %v1161_v9 }
 0x276   :  { %v1163_v0 = vpop.xlane.xlu0 %1162 }
 0x277   :  { %v1168_v27 = vadd.f32 %v1348_v63, %v1163_v0 }
 0x279   :  { %1169 = vst [vmem:[%s2067_s9] sm:$0xff] %v1168_v27 }
 0x27a   :  { %1174 = vsyncpa [#allocation3], 1 }
 0x27b   :  { %1175 = vsyncpa [#allocation5], 1 }

</bundles_post_ra>
